<compile_context>
chip_gen: v7x
topology: tpu7x:2x2x1
jax: 0.10.0
libtpu: 0.0.40
codegen_flags: <defaults>
</compile_context>

<pallas_src>
import functools

import jax
import jax.numpy as jnp
from jax.experimental import pallas as pl
from jax.experimental.pallas import tpu as pltpu


# ----------------------------- hyperparameters -----------------------------
N_EMBD     = 384                 # train.py n_embd
N_HEAD     = 6                   # train.py n_head
HEAD_SIZE  = N_EMBD // N_HEAD    # 64
BLOCK_SIZE = 256                 # max context length (mask built for actual T)
NEG_INF    = -1e30               # finite mask fill (avoids NaN on masked rows)


# ------------------------------- fused kernel -------------------------------
def mha_kernel(x_ref, bias_ref, wq_ref, wk_ref, wv_ref, wp_ref, bp_ref, o_ref,
               *, n_head):
    """Fused multi-head causal self-attention + output projection.

    x_ref            : (bb, T, C)        bfloat16 (cast in wrapper)
    bias_ref         : (T, T)            float32 additive causal mask (0 / -1e30)
    wq/wk/wv_ref     : (C, n_head*hs)    bfloat16 (wq pre-scaled by hs**-0.5)
    wp_ref           : (n_head*hs, C)    bfloat16
    bp_ref           : (1, C)            float32
    o_ref            : (bb, T, C)        float32
    """
    bb, T, C = x_ref.shape
    hs = C // n_head
    bf16, f32 = jnp.bfloat16, jnp.float32

    # (bb, T, C) -> (bb*T, C): leading/sublane merge only, no lane movement.
    xm = x_ref[...].reshape(bb * T, C)

    # Fused QKV projections: M = bb*T, K = N = 384 (well-shaped for the MXU).
    # The softmax scale is already folded into wq by the wrapper.
    q = jnp.dot(xm, wq_ref[...], preferred_element_type=f32)
    k = jnp.dot(xm, wk_ref[...], preferred_element_type=f32)
    v = jnp.dot(xm, wv_ref[...], preferred_element_type=f32)

    # bf16 BEFORE any head addressing; reshape back to (bb, T, C) is a
    # leading/sublane split only (no lane relayout).
    q3 = q.astype(bf16).reshape(bb, T, C)
    k3 = k.astype(bf16).reshape(bb, T, C)
    v3 = v.astype(bf16).reshape(bb, T, C)

    # Hoist the mask broadcast out of the per-head loop (no per-iter broadcast).
    bias = jnp.broadcast_to(bias_ref[...], (bb, T, T))

    # Heads live in the lane dimension; static 64-lane slices feed the MXU
    # einsums directly, so no per-head reshape/transpose/concat copies are
    # materialized.  The per-head matmuls are the exact MXU work a head-batched
    # einsum would issue (TPU batched matmul loops over the batch anyway).
    outs = []
    for h in range(n_head):
        sl = slice(h * hs, (h + 1) * hs)
        s = jnp.einsum("bqd,bkd->bqk", q3[:, :, sl], k3[:, :, sl],
                       preferred_element_type=f32)            # (bb, T, T) f32
        s = s + bias                                          # additive causal mask
        m = jnp.max(s, axis=-1, keepdims=True)
        e = jnp.exp(s - m)
        denom = jnp.sum(e, axis=-1, keepdims=True)
        p = (e * pl.reciprocal(denom, approx=True)).astype(bf16)  # EUP reciprocal
        # TODO(synk): training-mode dropout on attention weights not implemented (eval identity).
        outs.append(jnp.einsum("bqk,bkd->bqd", p, v3[:, :, sl],
                               preferred_element_type=f32).astype(bf16))

    # Single head-merge layout pass (bf16 lane concat) == torch.cat(..., dim=-1),
    # then the output projection with K = N = 384.
    att = jnp.concatenate(outs, axis=-1).reshape(bb * T, C)    # (bb*T, C) bf16
    out = jnp.dot(att, wp_ref[...], preferred_element_type=f32) + bp_ref[...]
    # TODO(synk): training-mode dropout after the projection not implemented (eval identity).

    o_ref[...] = out.reshape(bb, T, C)                         # lane-dense f32 store


# ------------------------------ block heuristics ------------------------------
def _pick_batch_block(B, T):
    """Target M = bb*T >= 256 rows per step (v6e/v7x 256x256 MXU), but keep the
    grid >= 2 steps whenever B > 1 so both v7x TensorCores get work."""
    upper = min(B, max(1, 256 // T))
    if B > 1:
        upper = min(upper, B // 2)
    upper = max(upper, 1)
    return next(d for d in range(upper, 0, -1) if B % d == 0)


def _vmem_limit_bytes(bb, T, C, n_head):
    """Generous scoped-VMEM estimate (v5e default is only 16 MiB)."""
    pad = lambda n, m: -(-n // m) * m
    Tp, Tl, Cp = pad(T, 8), pad(T, 128), pad(C, 128)
    rows = bb * Tp
    est = (2 * bb * Tp * Cp * (2 + 4)        # double-buffered x (bf16) + out (f32)
           + 4 * Cp * Cp * 2 + Cp * 4        # resident wq/wk/wv/wp (bf16) + proj bias
           + Tp * Tl * 4                     # resident causal bias
           + 3 * rows * Cp * (4 + 2)         # q/k/v f32 results + bf16 copies
           + 3 * bb * Tp * Tl * 4 * 2        # s / e / p live per head (headroom x2)
           + rows * Cp * (2 + 4))            # merged att (bf16) + out (f32)
    return int(min(max(2 * est, 32 * 1024 * 1024), 64 * 1024 * 1024))


# --------------------------------- wrapper ---------------------------------
def multi_head_attention(x, params, *, n_head=N_HEAD, batch_block=None):
    """x: float32 [B, T, C] -> float32 [B, T, C] (eval-mode forward)."""
    B, T, C = x.shape
    assert T <= BLOCK_SIZE
    hs = C // n_head

    bb = batch_block if batch_block is not None else _pick_batch_block(B, T)
    assert B % bb == 0
    grid = (B // bb,)

    # bf16 matmul operands (native MXU path); f32 accumulation inside the kernel.
    xb = x.astype(jnp.bfloat16)                                # half the input DMA bytes
    wq = (params["wq"] * (hs ** -0.5)).astype(jnp.bfloat16)    # fold softmax scale into wq
    wk = params["wk"].astype(jnp.bfloat16)
    wv = params["wv"].astype(jnp.bfloat16)
    wp = params["wp"].astype(jnp.bfloat16)
    bp = params["bp"].astype(jnp.float32)
    # Additive causal mask built once outside the kernel; resident in VMEM
    # (constant index_map) across all grid steps.
    tri = jnp.tril(jnp.ones((T, T), dtype=bool))
    bias = jnp.where(tri, 0.0, NEG_INF).astype(jnp.float32)

    full = lambda a: pl.BlockSpec(a.shape, lambda i: (0,) * a.ndim)

    return pl.pallas_call(
        functools.partial(mha_kernel, n_head=n_head),
        out_shape=jax.ShapeDtypeStruct((B, T, C), jnp.float32),
        grid=grid,
        in_specs=[pl.BlockSpec((bb, T, C), lambda i: (i, 0, 0)),
                  full(bias), full(wq), full(wk), full(wv), full(wp), full(bp)],
        out_specs=pl.BlockSpec((bb, T, C), lambda i: (i, 0, 0)),
        compiler_params=pltpu.CompilerParams(
            dimension_semantics=("parallel",),
            vmem_limit_bytes=_vmem_limit_bytes(bb, T, C, n_head)),
    )(xb, bias, wq, wk, wv, wp, bp)


# ------------------------------ parameter init ------------------------------
def init_params(key, n_embd=N_EMBD, n_head=N_HEAD, head_size=HEAD_SIZE):
    std = 0.02
    k1, k2, k3, k4, k5 = jax.random.split(key, 5)
    d = n_head * head_size
    nrm = lambda k, shape: (std * jax.random.normal(k, shape)).astype(jnp.float32)
    return {
        # per-head K/Q/V linears (n_embd -> head_size, no bias), concatenated
        # head-major along the output axis; stored pre-transposed as [in, out].
        "wq": nrm(k1, (n_embd, d)),
        "wk": nrm(k2, (n_embd, d)),
        "wv": nrm(k3, (n_embd, d)),
        "wp": nrm(k4, (d, n_embd)),           # proj: Linear(d, n_embd)
        "bp": nrm(k5, (1, n_embd)),
    }


# ------------------------------ pure-JAX reference ------------------------------
def ref_mha(x, params, *, n_head=N_HEAD):
    """Plain-JAX reference with matching bf16-operand / f32-accumulate precision."""
    B, T, C = x.shape
    hs = params["wq"].shape[1] // n_head
    bf, f32 = jnp.bfloat16, jnp.float32

    xb = x.astype(bf)
    wq = (params["wq"] * (hs ** -0.5)).astype(bf)
    wk = params["wk"].astype(bf)
    wv = params["wv"].astype(bf)
    wp = params["wp"].astype(bf)

    q = jnp.einsum("btc,cd->btd", xb, wq, preferred_element_type=f32).astype(bf)
    k = jnp.einsum("btc,cd->btd", xb, wk, preferred_element_type=f32).astype(bf)
    v = jnp.einsum("btc,cd->btd", xb, wv, preferred_element_type=f32).astype(bf)

    heads = lambda t: t.reshape(B, T, n_head, hs).transpose(0, 2, 1, 3)
    qh, kh, vh = heads(q), heads(k), heads(v)

    s = jnp.einsum("bhqd,bhkd->bhqk", qh, kh, preferred_element_type=f32)
    mask = jnp.tril(jnp.ones((T, T), bool))
    s = s + jnp.where(mask, 0.0, NEG_INF)
    p = jax.nn.softmax(s, axis=-1).astype(bf)

    o = jnp.einsum("bhqk,bhkd->bhqd", p, vh, preferred_element_type=f32).astype(bf)
    att = o.transpose(0, 2, 1, 3).reshape(B, T, n_head * hs)
    return jnp.einsum("btd,dc->btc", att, wp,
                      preferred_element_type=f32) + params["bp"]


# ------------------------------------ main ------------------------------------
if __name__ == "__main__":
    key = jax.random.PRNGKey(0)
    pkey, xkey = jax.random.split(key)
    params = init_params(pkey)

    B, T = 2, 16                           # small shapes; T <= block_size (256)
    x = jax.random.normal(xkey, (B, T, N_EMBD), dtype=jnp.float32)

    out = multi_head_attention(x, params, n_head=N_HEAD)
    out = jax.block_until_ready(out)
    assert out.shape == (B, T, N_EMBD) and out.dtype == jnp.float32

    ref = ref_mha(x, params, n_head=N_HEAD)
    max_err = float(jnp.max(jnp.abs(out - ref)))
    assert jnp.allclose(out, ref, atol=5e-3, rtol=5e-3), \
        f"mismatch vs JAX reference (max_err={max_err})"

    print("KERNEL_OK")
</pallas_src>

<mosaic_0001>
module attributes {stable_mosaic.version = 11 : i64} {
  func.func @mha_kernel(%arg0: i32, %arg1: memref<1x16x384xbf16, #tpu.memory_space<vmem>>, %arg2: memref<16x16xf32, #tpu.memory_space<vmem>>, %arg3: memref<384x384xbf16, #tpu.memory_space<vmem>>, %arg4: memref<384x384xbf16, #tpu.memory_space<vmem>>, %arg5: memref<384x384xbf16, #tpu.memory_space<vmem>>, %arg6: memref<384x384xbf16, #tpu.memory_space<vmem>>, %arg7: memref<1x384xf32, #tpu.memory_space<vmem>>, %arg8: memref<1x16x384xf32, #tpu.memory_space<vmem>>) attributes {dimension_semantics = [#tpu.dimension_semantics<parallel>], iteration_bounds = array<i64: 2>, scalar_prefetch = 0 : i64, scratch_operands = 0 : i64, tpu.core_type = #tpu.core_type<tc>, window_params = [{transform_indices = @transform_0, window_bounds = array<i64: 1, 16, 384>}, {pipeline_mode = #tpu.pipeline_mode<synchronous>, transform_indices = @transform_1, window_bounds = array<i64: 16, 16>}, {pipeline_mode = #tpu.pipeline_mode<synchronous>, transform_indices = @transform_2, window_bounds = array<i64: 384, 384>}, {pipeline_mode = #tpu.pipeline_mode<synchronous>, transform_indices = @transform_3, window_bounds = array<i64: 384, 384>}, {pipeline_mode = #tpu.pipeline_mode<synchronous>, transform_indices = @transform_4, window_bounds = array<i64: 384, 384>}, {pipeline_mode = #tpu.pipeline_mode<synchronous>, transform_indices = @transform_5, window_bounds = array<i64: 384, 384>}, {pipeline_mode = #tpu.pipeline_mode<synchronous>, transform_indices = @transform_6, window_bounds = array<i64: 1, 384>}, {transform_indices = @transform_7, window_bounds = array<i64: 1, 16, 384>}]} {
    %c0 = arith.constant 0 : index
    %c0_0 = arith.constant 0 : index
    %c0_1 = arith.constant 0 : index
    %0 = vector.load %arg1[%c0, %c0_0, %c0_1] : memref<1x16x384xbf16, #tpu.memory_space<vmem>>, vector<1x16x384xbf16>
    %1 = vector.shape_cast %0 : vector<1x16x384xbf16> to vector<16x384xbf16>
    %c0_2 = arith.constant 0 : index
    %c0_3 = arith.constant 0 : index
    %2 = vector.load %arg3[%c0_2, %c0_3] : memref<384x384xbf16, #tpu.memory_space<vmem>>, vector<384x384xbf16>
    %cst = arith.constant dense<0.000000e+00> : vector<16x384xf32>
    %3 = tpu.matmul %1, %2, %cst {dimension_numbers = #tpu.dot_dimension_numbers<[1], [0], [0], [1], [0, 0, 1, 1], [], []>} : vector<16x384xbf16>, vector<384x384xbf16>, vector<16x384xf32> -> vector<16x384xf32>
    %c0_4 = arith.constant 0 : index
    %c0_5 = arith.constant 0 : index
    %4 = vector.load %arg4[%c0_4, %c0_5] : memref<384x384xbf16, #tpu.memory_space<vmem>>, vector<384x384xbf16>
    %cst_6 = arith.constant dense<0.000000e+00> : vector<16x384xf32>
    %5 = tpu.matmul %1, %4, %cst_6 {dimension_numbers = #tpu.dot_dimension_numbers<[1], [0], [0], [1], [0, 0, 1, 1], [], []>} : vector<16x384xbf16>, vector<384x384xbf16>, vector<16x384xf32> -> vector<16x384xf32>
    %c0_7 = arith.constant 0 : index
    %c0_8 = arith.constant 0 : index
    %6 = vector.load %arg5[%c0_7, %c0_8] : memref<384x384xbf16, #tpu.memory_space<vmem>>, vector<384x384xbf16>
    %cst_9 = arith.constant dense<0.000000e+00> : vector<16x384xf32>
    %7 = tpu.matmul %1, %6, %cst_9 {dimension_numbers = #tpu.dot_dimension_numbers<[1], [0], [0], [1], [0, 0, 1, 1], [], []>} : vector<16x384xbf16>, vector<384x384xbf16>, vector<16x384xf32> -> vector<16x384xf32>
    %8 = arith.truncf %3 : vector<16x384xf32> to vector<16x384xbf16>
    %9 = vector.shape_cast %8 : vector<16x384xbf16> to vector<1x16x384xbf16>
    %10 = arith.truncf %5 : vector<16x384xf32> to vector<16x384xbf16>
    %11 = vector.shape_cast %10 : vector<16x384xbf16> to vector<1x16x384xbf16>
    %12 = arith.truncf %7 : vector<16x384xf32> to vector<16x384xbf16>
    %13 = vector.shape_cast %12 : vector<16x384xbf16> to vector<1x16x384xbf16>
    %c0_10 = arith.constant 0 : index
    %c0_11 = arith.constant 0 : index
    %14 = vector.load %arg2[%c0_10, %c0_11] : memref<16x16xf32, #tpu.memory_space<vmem>>, vector<16x16xf32>
    %15 = vector.shape_cast %14 : vector<16x16xf32> to vector<1x16x16xf32>
    %16 = vector.extract_strided_slice %9 {offsets = [0, 0, 0], sizes = [1, 16, 64], strides = [1, 1, 1]} : vector<1x16x384xbf16> to vector<1x16x64xbf16>
    %17 = vector.extract_strided_slice %11 {offsets = [0, 0, 0], sizes = [1, 16, 64], strides = [1, 1, 1]} : vector<1x16x384xbf16> to vector<1x16x64xbf16>
    "tpu.trace_start"() <{level = 10 : i32, message = "bqd,bkd->bqk"}> : () -> ()
    %cst_12 = arith.constant dense<0.000000e+00> : vector<1x16x16xf32>
    %18 = tpu.matmul %16, %17, %cst_12 {dimension_numbers = #tpu.dot_dimension_numbers<[2], [2], [1], [1], [0, 0, 0, 1, 1, 1], [0], [0]>} : vector<1x16x64xbf16>, vector<1x16x64xbf16>, vector<1x16x16xf32> -> vector<1x16x16xf32>
    "tpu.trace_stop"() : () -> ()
    %19 = arith.addf %18, %15 : vector<1x16x16xf32>
    %cst_13 = arith.constant dense<0xFF800000> : vector<1x16xf32>
    %20 = vector.multi_reduction <maximumf>, %19, %cst_13 [2] : vector<1x16x16xf32> to vector<1x16xf32>
    %21 = vector.shape_cast %20 : vector<1x16xf32> to vector<1x16x1xf32>
    %22 = vector.broadcast %21 : vector<1x16x1xf32> to vector<1x16x16xf32>
    %23 = arith.subf %19, %22 : vector<1x16x16xf32>
    %24 = math.exp %23 : vector<1x16x16xf32>
    %cst_14 = arith.constant dense<0.000000e+00> : vector<1x16xf32>
    %25 = vector.multi_reduction <add>, %24, %cst_14 [2] : vector<1x16x16xf32> to vector<1x16xf32>
    %26 = vector.shape_cast %25 : vector<1x16xf32> to vector<1x16x1xf32>
    %27 = tpu.reciprocal %26 {approx = true} : vector<1x16x1xf32> -> vector<1x16x1xf32>
    %28 = vector.broadcast %27 : vector<1x16x1xf32> to vector<1x16x16xf32>
    %29 = arith.mulf %24, %28 : vector<1x16x16xf32>
    %30 = arith.truncf %29 : vector<1x16x16xf32> to vector<1x16x16xbf16>
    %31 = vector.extract_strided_slice %13 {offsets = [0, 0, 0], sizes = [1, 16, 64], strides = [1, 1, 1]} : vector<1x16x384xbf16> to vector<1x16x64xbf16>
    "tpu.trace_start"() <{level = 10 : i32, message = "bqk,bkd->bqd"}> : () -> ()
    %cst_15 = arith.constant dense<0.000000e+00> : vector<1x16x64xf32>
    %32 = tpu.matmul %30, %31, %cst_15 {dimension_numbers = #tpu.dot_dimension_numbers<[2], [1], [1], [2], [0, 0, 0, 1, 1, 2], [0], [0]>} : vector<1x16x16xbf16>, vector<1x16x64xbf16>, vector<1x16x64xf32> -> vector<1x16x64xf32>
    "tpu.trace_stop"() : () -> ()
    %33 = arith.truncf %32 : vector<1x16x64xf32> to vector<1x16x64xbf16>
    %34 = vector.extract_strided_slice %9 {offsets = [0, 0, 64], sizes = [1, 16, 64], strides = [1, 1, 1]} : vector<1x16x384xbf16> to vector<1x16x64xbf16>
    %35 = vector.extract_strided_slice %11 {offsets = [0, 0, 64], sizes = [1, 16, 64], strides = [1, 1, 1]} : vector<1x16x384xbf16> to vector<1x16x64xbf16>
    "tpu.trace_start"() <{level = 10 : i32, message = "bqd,bkd->bqk"}> : () -> ()
    %cst_16 = arith.constant dense<0.000000e+00> : vector<1x16x16xf32>
    %36 = tpu.matmul %34, %35, %cst_16 {dimension_numbers = #tpu.dot_dimension_numbers<[2], [2], [1], [1], [0, 0, 0, 1, 1, 1], [0], [0]>} : vector<1x16x64xbf16>, vector<1x16x64xbf16>, vector<1x16x16xf32> -> vector<1x16x16xf32>
    "tpu.trace_stop"() : () -> ()
    %37 = arith.addf %36, %15 : vector<1x16x16xf32>
    %cst_17 = arith.constant dense<0xFF800000> : vector<1x16xf32>
    %38 = vector.multi_reduction <maximumf>, %37, %cst_17 [2] : vector<1x16x16xf32> to vector<1x16xf32>
    %39 = vector.shape_cast %38 : vector<1x16xf32> to vector<1x16x1xf32>
    %40 = vector.broadcast %39 : vector<1x16x1xf32> to vector<1x16x16xf32>
    %41 = arith.subf %37, %40 : vector<1x16x16xf32>
    %42 = math.exp %41 : vector<1x16x16xf32>
    %cst_18 = arith.constant dense<0.000000e+00> : vector<1x16xf32>
    %43 = vector.multi_reduction <add>, %42, %cst_18 [2] : vector<1x16x16xf32> to vector<1x16xf32>
    %44 = vector.shape_cast %43 : vector<1x16xf32> to vector<1x16x1xf32>
    %45 = tpu.reciprocal %44 {approx = true} : vector<1x16x1xf32> -> vector<1x16x1xf32>
    %46 = vector.broadcast %45 : vector<1x16x1xf32> to vector<1x16x16xf32>
    %47 = arith.mulf %42, %46 : vector<1x16x16xf32>
    %48 = arith.truncf %47 : vector<1x16x16xf32> to vector<1x16x16xbf16>
    %49 = vector.extract_strided_slice %13 {offsets = [0, 0, 64], sizes = [1, 16, 64], strides = [1, 1, 1]} : vector<1x16x384xbf16> to vector<1x16x64xbf16>
    "tpu.trace_start"() <{level = 10 : i32, message = "bqk,bkd->bqd"}> : () -> ()
    %cst_19 = arith.constant dense<0.000000e+00> : vector<1x16x64xf32>
    %50 = tpu.matmul %48, %49, %cst_19 {dimension_numbers = #tpu.dot_dimension_numbers<[2], [1], [1], [2], [0, 0, 0, 1, 1, 2], [0], [0]>} : vector<1x16x16xbf16>, vector<1x16x64xbf16>, vector<1x16x64xf32> -> vector<1x16x64xf32>
    "tpu.trace_stop"() : () -> ()
    %51 = arith.truncf %50 : vector<1x16x64xf32> to vector<1x16x64xbf16>
    %52 = vector.extract_strided_slice %9 {offsets = [0, 0, 128], sizes = [1, 16, 64], strides = [1, 1, 1]} : vector<1x16x384xbf16> to vector<1x16x64xbf16>
    %53 = vector.extract_strided_slice %11 {offsets = [0, 0, 128], sizes = [1, 16, 64], strides = [1, 1, 1]} : vector<1x16x384xbf16> to vector<1x16x64xbf16>
    "tpu.trace_start"() <{level = 10 : i32, message = "bqd,bkd->bqk"}> : () -> ()
    %cst_20 = arith.constant dense<0.000000e+00> : vector<1x16x16xf32>
    %54 = tpu.matmul %52, %53, %cst_20 {dimension_numbers = #tpu.dot_dimension_numbers<[2], [2], [1], [1], [0, 0, 0, 1, 1, 1], [0], [0]>} : vector<1x16x64xbf16>, vector<1x16x64xbf16>, vector<1x16x16xf32> -> vector<1x16x16xf32>
    "tpu.trace_stop"() : () -> ()
    %55 = arith.addf %54, %15 : vector<1x16x16xf32>
    %cst_21 = arith.constant dense<0xFF800000> : vector<1x16xf32>
    %56 = vector.multi_reduction <maximumf>, %55, %cst_21 [2] : vector<1x16x16xf32> to vector<1x16xf32>
    %57 = vector.shape_cast %56 : vector<1x16xf32> to vector<1x16x1xf32>
    %58 = vector.broadcast %57 : vector<1x16x1xf32> to vector<1x16x16xf32>
    %59 = arith.subf %55, %58 : vector<1x16x16xf32>
    %60 = math.exp %59 : vector<1x16x16xf32>
    %cst_22 = arith.constant dense<0.000000e+00> : vector<1x16xf32>
    %61 = vector.multi_reduction <add>, %60, %cst_22 [2] : vector<1x16x16xf32> to vector<1x16xf32>
    %62 = vector.shape_cast %61 : vector<1x16xf32> to vector<1x16x1xf32>
    %63 = tpu.reciprocal %62 {approx = true} : vector<1x16x1xf32> -> vector<1x16x1xf32>
    %64 = vector.broadcast %63 : vector<1x16x1xf32> to vector<1x16x16xf32>
    %65 = arith.mulf %60, %64 : vector<1x16x16xf32>
    %66 = arith.truncf %65 : vector<1x16x16xf32> to vector<1x16x16xbf16>
    %67 = vector.extract_strided_slice %13 {offsets = [0, 0, 128], sizes = [1, 16, 64], strides = [1, 1, 1]} : vector<1x16x384xbf16> to vector<1x16x64xbf16>
    "tpu.trace_start"() <{level = 10 : i32, message = "bqk,bkd->bqd"}> : () -> ()
    %cst_23 = arith.constant dense<0.000000e+00> : vector<1x16x64xf32>
    %68 = tpu.matmul %66, %67, %cst_23 {dimension_numbers = #tpu.dot_dimension_numbers<[2], [1], [1], [2], [0, 0, 0, 1, 1, 2], [0], [0]>} : vector<1x16x16xbf16>, vector<1x16x64xbf16>, vector<1x16x64xf32> -> vector<1x16x64xf32>
    "tpu.trace_stop"() : () -> ()
    %69 = arith.truncf %68 : vector<1x16x64xf32> to vector<1x16x64xbf16>
    %70 = vector.extract_strided_slice %9 {offsets = [0, 0, 192], sizes = [1, 16, 64], strides = [1, 1, 1]} : vector<1x16x384xbf16> to vector<1x16x64xbf16>
    %71 = vector.extract_strided_slice %11 {offsets = [0, 0, 192], sizes = [1, 16, 64], strides = [1, 1, 1]} : vector<1x16x384xbf16> to vector<1x16x64xbf16>
    "tpu.trace_start"() <{level = 10 : i32, message = "bqd,bkd->bqk"}> : () -> ()
    %cst_24 = arith.constant dense<0.000000e+00> : vector<1x16x16xf32>
    %72 = tpu.matmul %70, %71, %cst_24 {dimension_numbers = #tpu.dot_dimension_numbers<[2], [2], [1], [1], [0, 0, 0, 1, 1, 1], [0], [0]>} : vector<1x16x64xbf16>, vector<1x16x64xbf16>, vector<1x16x16xf32> -> vector<1x16x16xf32>
    "tpu.trace_stop"() : () -> ()
    %73 = arith.addf %72, %15 : vector<1x16x16xf32>
    %cst_25 = arith.constant dense<0xFF800000> : vector<1x16xf32>
    %74 = vector.multi_reduction <maximumf>, %73, %cst_25 [2] : vector<1x16x16xf32> to vector<1x16xf32>
    %75 = vector.shape_cast %74 : vector<1x16xf32> to vector<1x16x1xf32>
    %76 = vector.broadcast %75 : vector<1x16x1xf32> to vector<1x16x16xf32>
    %77 = arith.subf %73, %76 : vector<1x16x16xf32>
    %78 = math.exp %77 : vector<1x16x16xf32>
    %cst_26 = arith.constant dense<0.000000e+00> : vector<1x16xf32>
    %79 = vector.multi_reduction <add>, %78, %cst_26 [2] : vector<1x16x16xf32> to vector<1x16xf32>
    %80 = vector.shape_cast %79 : vector<1x16xf32> to vector<1x16x1xf32>
    %81 = tpu.reciprocal %80 {approx = true} : vector<1x16x1xf32> -> vector<1x16x1xf32>
    %82 = vector.broadcast %81 : vector<1x16x1xf32> to vector<1x16x16xf32>
    %83 = arith.mulf %78, %82 : vector<1x16x16xf32>
    %84 = arith.truncf %83 : vector<1x16x16xf32> to vector<1x16x16xbf16>
    %85 = vector.extract_strided_slice %13 {offsets = [0, 0, 192], sizes = [1, 16, 64], strides = [1, 1, 1]} : vector<1x16x384xbf16> to vector<1x16x64xbf16>
    "tpu.trace_start"() <{level = 10 : i32, message = "bqk,bkd->bqd"}> : () -> ()
    %cst_27 = arith.constant dense<0.000000e+00> : vector<1x16x64xf32>
    %86 = tpu.matmul %84, %85, %cst_27 {dimension_numbers = #tpu.dot_dimension_numbers<[2], [1], [1], [2], [0, 0, 0, 1, 1, 2], [0], [0]>} : vector<1x16x16xbf16>, vector<1x16x64xbf16>, vector<1x16x64xf32> -> vector<1x16x64xf32>
    "tpu.trace_stop"() : () -> ()
    %87 = arith.truncf %86 : vector<1x16x64xf32> to vector<1x16x64xbf16>
    %88 = vector.extract_strided_slice %9 {offsets = [0, 0, 256], sizes = [1, 16, 64], strides = [1, 1, 1]} : vector<1x16x384xbf16> to vector<1x16x64xbf16>
    %89 = vector.extract_strided_slice %11 {offsets = [0, 0, 256], sizes = [1, 16, 64], strides = [1, 1, 1]} : vector<1x16x384xbf16> to vector<1x16x64xbf16>
    "tpu.trace_start"() <{level = 10 : i32, message = "bqd,bkd->bqk"}> : () -> ()
    %cst_28 = arith.constant dense<0.000000e+00> : vector<1x16x16xf32>
    %90 = tpu.matmul %88, %89, %cst_28 {dimension_numbers = #tpu.dot_dimension_numbers<[2], [2], [1], [1], [0, 0, 0, 1, 1, 1], [0], [0]>} : vector<1x16x64xbf16>, vector<1x16x64xbf16>, vector<1x16x16xf32> -> vector<1x16x16xf32>
    "tpu.trace_stop"() : () -> ()
    %91 = arith.addf %90, %15 : vector<1x16x16xf32>
    %cst_29 = arith.constant dense<0xFF800000> : vector<1x16xf32>
    %92 = vector.multi_reduction <maximumf>, %91, %cst_29 [2] : vector<1x16x16xf32> to vector<1x16xf32>
    %93 = vector.shape_cast %92 : vector<1x16xf32> to vector<1x16x1xf32>
    %94 = vector.broadcast %93 : vector<1x16x1xf32> to vector<1x16x16xf32>
    %95 = arith.subf %91, %94 : vector<1x16x16xf32>
    %96 = math.exp %95 : vector<1x16x16xf32>
    %cst_30 = arith.constant dense<0.000000e+00> : vector<1x16xf32>
    %97 = vector.multi_reduction <add>, %96, %cst_30 [2] : vector<1x16x16xf32> to vector<1x16xf32>
    %98 = vector.shape_cast %97 : vector<1x16xf32> to vector<1x16x1xf32>
    %99 = tpu.reciprocal %98 {approx = true} : vector<1x16x1xf32> -> vector<1x16x1xf32>
    %100 = vector.broadcast %99 : vector<1x16x1xf32> to vector<1x16x16xf32>
    %101 = arith.mulf %96, %100 : vector<1x16x16xf32>
    %102 = arith.truncf %101 : vector<1x16x16xf32> to vector<1x16x16xbf16>
    %103 = vector.extract_strided_slice %13 {offsets = [0, 0, 256], sizes = [1, 16, 64], strides = [1, 1, 1]} : vector<1x16x384xbf16> to vector<1x16x64xbf16>
    "tpu.trace_start"() <{level = 10 : i32, message = "bqk,bkd->bqd"}> : () -> ()
    %cst_31 = arith.constant dense<0.000000e+00> : vector<1x16x64xf32>
    %104 = tpu.matmul %102, %103, %cst_31 {dimension_numbers = #tpu.dot_dimension_numbers<[2], [1], [1], [2], [0, 0, 0, 1, 1, 2], [0], [0]>} : vector<1x16x16xbf16>, vector<1x16x64xbf16>, vector<1x16x64xf32> -> vector<1x16x64xf32>
    "tpu.trace_stop"() : () -> ()
    %105 = arith.truncf %104 : vector<1x16x64xf32> to vector<1x16x64xbf16>
    %106 = vector.extract_strided_slice %9 {offsets = [0, 0, 320], sizes = [1, 16, 64], strides = [1, 1, 1]} : vector<1x16x384xbf16> to vector<1x16x64xbf16>
    %107 = vector.extract_strided_slice %11 {offsets = [0, 0, 320], sizes = [1, 16, 64], strides = [1, 1, 1]} : vector<1x16x384xbf16> to vector<1x16x64xbf16>
    "tpu.trace_start"() <{level = 10 : i32, message = "bqd,bkd->bqk"}> : () -> ()
    %cst_32 = arith.constant dense<0.000000e+00> : vector<1x16x16xf32>
    %108 = tpu.matmul %106, %107, %cst_32 {dimension_numbers = #tpu.dot_dimension_numbers<[2], [2], [1], [1], [0, 0, 0, 1, 1, 1], [0], [0]>} : vector<1x16x64xbf16>, vector<1x16x64xbf16>, vector<1x16x16xf32> -> vector<1x16x16xf32>
    "tpu.trace_stop"() : () -> ()
    %109 = arith.addf %108, %15 : vector<1x16x16xf32>
    %cst_33 = arith.constant dense<0xFF800000> : vector<1x16xf32>
    %110 = vector.multi_reduction <maximumf>, %109, %cst_33 [2] : vector<1x16x16xf32> to vector<1x16xf32>
    %111 = vector.shape_cast %110 : vector<1x16xf32> to vector<1x16x1xf32>
    %112 = vector.broadcast %111 : vector<1x16x1xf32> to vector<1x16x16xf32>
    %113 = arith.subf %109, %112 : vector<1x16x16xf32>
    %114 = math.exp %113 : vector<1x16x16xf32>
    %cst_34 = arith.constant dense<0.000000e+00> : vector<1x16xf32>
    %115 = vector.multi_reduction <add>, %114, %cst_34 [2] : vector<1x16x16xf32> to vector<1x16xf32>
    %116 = vector.shape_cast %115 : vector<1x16xf32> to vector<1x16x1xf32>
    %117 = tpu.reciprocal %116 {approx = true} : vector<1x16x1xf32> -> vector<1x16x1xf32>
    %118 = vector.broadcast %117 : vector<1x16x1xf32> to vector<1x16x16xf32>
    %119 = arith.mulf %114, %118 : vector<1x16x16xf32>
    %120 = arith.truncf %119 : vector<1x16x16xf32> to vector<1x16x16xbf16>
    %121 = vector.extract_strided_slice %13 {offsets = [0, 0, 320], sizes = [1, 16, 64], strides = [1, 1, 1]} : vector<1x16x384xbf16> to vector<1x16x64xbf16>
    "tpu.trace_start"() <{level = 10 : i32, message = "bqk,bkd->bqd"}> : () -> ()
    %cst_35 = arith.constant dense<0.000000e+00> : vector<1x16x64xf32>
    %122 = tpu.matmul %120, %121, %cst_35 {dimension_numbers = #tpu.dot_dimension_numbers<[2], [1], [1], [2], [0, 0, 0, 1, 1, 2], [0], [0]>} : vector<1x16x16xbf16>, vector<1x16x64xbf16>, vector<1x16x64xf32> -> vector<1x16x64xf32>
    "tpu.trace_stop"() : () -> ()
    %123 = arith.truncf %122 : vector<1x16x64xf32> to vector<1x16x64xbf16>
    %124 = tpu.concatenate %33, %51, %69, %87, %105, %123 in 2 : vector<1x16x64xbf16>, vector<1x16x64xbf16>, vector<1x16x64xbf16>, vector<1x16x64xbf16>, vector<1x16x64xbf16>, vector<1x16x64xbf16> -> vector<1x16x384xbf16>
    %125 = vector.shape_cast %124 : vector<1x16x384xbf16> to vector<16x384xbf16>
    %c0_36 = arith.constant 0 : index
    %c0_37 = arith.constant 0 : index
    %126 = vector.load %arg6[%c0_36, %c0_37] : memref<384x384xbf16, #tpu.memory_space<vmem>>, vector<384x384xbf16>
    %cst_38 = arith.constant dense<0.000000e+00> : vector<16x384xf32>
    %127 = tpu.matmul %125, %126, %cst_38 {dimension_numbers = #tpu.dot_dimension_numbers<[1], [0], [0], [1], [0, 0, 1, 1], [], []>} : vector<16x384xbf16>, vector<384x384xbf16>, vector<16x384xf32> -> vector<16x384xf32>
    %c0_39 = arith.constant 0 : index
    %c0_40 = arith.constant 0 : index
    %128 = vector.load %arg7[%c0_39, %c0_40] : memref<1x384xf32, #tpu.memory_space<vmem>>, vector<1x384xf32>
    %129 = vector.broadcast %128 : vector<1x384xf32> to vector<16x384xf32>
    %130 = arith.addf %127, %129 : vector<16x384xf32>
    %131 = vector.shape_cast %130 : vector<16x384xf32> to vector<1x16x384xf32>
    %c0_41 = arith.constant 0 : index
    %c0_42 = arith.constant 0 : index
    %c0_43 = arith.constant 0 : index
    %132 = vector.load %arg8[%c0_41, %c0_42, %c0_43] : memref<1x16x384xf32, #tpu.memory_space<vmem>>, vector<1x16x384xf32>
    tpu.vector_store %arg8[%c0_41, %c0_42, %c0_43], %131 {strides = array<i32>} : memref<1x16x384xf32, #tpu.memory_space<vmem>>, vector<1x16x384xf32>,
    return
  }
  func.func @transform_0(%arg0: i32) -> (i32, i32, i32) {
    %c0_i32 = arith.constant 0 : i32
    %c0_i32_0 = arith.constant 0 : i32
    %c0_i32_1 = arith.constant 0 : i32
    return %arg0, %c0_i32, %c0_i32_0 : i32, i32, i32
  }
  func.func @transform_1(%arg0: i32) -> (i32, i32) {
    %c0_i32 = arith.constant 0 : i32
    %c0_i32_0 = arith.constant 0 : i32
    %c0_i32_1 = arith.constant 0 : i32
    return %c0_i32, %c0_i32_0 : i32, i32
  }
  func.func @transform_2(%arg0: i32) -> (i32, i32) {
    %c0_i32 = arith.constant 0 : i32
    %c0_i32_0 = arith.constant 0 : i32
    %c0_i32_1 = arith.constant 0 : i32
    return %c0_i32, %c0_i32_0 : i32, i32
  }
  func.func @transform_3(%arg0: i32) -> (i32, i32) {
    %c0_i32 = arith.constant 0 : i32
    %c0_i32_0 = arith.constant 0 : i32
    %c0_i32_1 = arith.constant 0 : i32
    return %c0_i32, %c0_i32_0 : i32, i32
  }
  func.func @transform_4(%arg0: i32) -> (i32, i32) {
    %c0_i32 = arith.constant 0 : i32
    %c0_i32_0 = arith.constant 0 : i32
    %c0_i32_1 = arith.constant 0 : i32
    return %c0_i32, %c0_i32_0 : i32, i32
  }
  func.func @transform_5(%arg0: i32) -> (i32, i32) {
    %c0_i32 = arith.constant 0 : i32
    %c0_i32_0 = arith.constant 0 : i32
    %c0_i32_1 = arith.constant 0 : i32
    return %c0_i32, %c0_i32_0 : i32, i32
  }
  func.func @transform_6(%arg0: i32) -> (i32, i32) {
    %c0_i32 = arith.constant 0 : i32
    %c0_i32_0 = arith.constant 0 : i32
    %c0_i32_1 = arith.constant 0 : i32
    return %c0_i32, %c0_i32_0 : i32, i32
  }
  func.func @transform_7(%arg0: i32) -> (i32, i32, i32) {
    %c0_i32 = arith.constant 0 : i32
    %c0_i32_0 = arith.constant 0 : i32
    %c0_i32_1 = arith.constant 0 : i32
    return %arg0, %c0_i32, %c0_i32_0 : i32, i32, i32
  }
}

</mosaic_0001>

<bundles_post_ra>
// kernel: tpu_custom_call.1
= control target key start
LH: loop header
LB: loop body
LE: loop exit
PB: predicated region body
PF: predicated region fallthrough
CT: control target
= control target key end

     0   :  { %s5969_s0 = inlined_call_operand.hbm [shape: bf16[2,16,384], index: 0, kind: input, shape index: {}]   ;;  %s5970_s1 = inlined_call_operand.hbm [shape: f32[16,16], index: 1, kind: input, shape index: {}]   ;;  %s5971_s2 = inlined_call_operand.hbm [shape: bf16[384,384], index: 2, kind: input, shape index: {}]   ;;  %s5972_s3 = inlined_call_operand.hbm [shape: bf16[384,384], index: 3, kind: input, shape index: {}]   ;;  %s5973_s4 = inlined_call_operand.hbm [shape: bf16[384,384], index: 4, kind: input, shape index: {}]   ;;  %s5974_s5 = inlined_call_operand.hbm [shape: bf16[384,384], index: 5, kind: input, shape index: {}]   ;;  %s5975_s6 = inlined_call_operand.vmem [shape: f32[1,384], index: 6, kind: input, shape index: {}]   ;;  %s5976_s7 = inlined_call_operand.hbm [shape: f32[2,16,384], index: 7, kind: output, shape index: {}]  }
   0x1   :  { %5982 = sst [smem:[#allocation19_spill]] %s5970_s1 }
   0x2   :  { %12 = vsyncpa [#allocation3], 0 }
   0x3   :  { %14 = vsyncpa [#allocation3 + $0x1], 0 }
   0x4   :  { %15 = vsyncpa [#allocation6], 0 }
   0x5   :  { %16 = vsyncpa [#allocation9], 0 }
   0x6   :  { %17 = vsyncpa [#allocation12], 0 }
   0x7   :  { %18 = vsyncpa [#allocation4], 0 }
   0x8   :  { %20 = vsyncpa [#allocation4 + $0x1], 0  ;;  %s5394_s24 = smov 0   ;;  %s5396_s25 = smov 0  }
   0x9   :  { %s5398_s26 = smov 0   ;;  %s5400_s27 = smov 0  }
   0xa LB: > { %s5337_s28 = smov [#allocation5]   ;;  %s5415_s30 = sadd.s32 4294967295, %s5335_s27   ;;  %s5335_s27 = sphi %s5400_s27, %s6007_s27   ;;  %s5331_s26 = sphi %s5398_s26, %s6006_s26   ;;  %s5327_s25 = sphi %s5396_s25, %s6005_s25   ;;  %s5323_s24 = sphi %s5394_s24, %s6004_s24  }
   0xb   : > { %s221_s29 = sshll.u32 %s5337_s28, 4  ;;  %p3896_p0 = scmp.ge.s32.totalorder %s5335_s27, 1  ;;  %s5420_s29 = int_to_ptr.vmem [resolvable:$true] %s221_s29 }
   0xc   : > { %p5977_p1 = scmp.eq.s32.totalorder %s5415_s30, 0  ;;  %p209_p2 = scmp.lt.s32.totalorder %s5335_s27, 3 }
   0xd   : > { %s5338_s10 = smov [#allocation8]   ;;  %s5339_s12 = smov [#allocation7]  }
   0xe   : > { %p5422_p3 = pnand %p3896_p0, %p209_p2  ;;  %s247_s11 = sshll.u32 %s5338_s10, 4  ;;  %s5435_s11 = int_to_ptr.vmem [resolvable:$true] %s247_s11 }
   0xf   : > { %s5437_s13 = sshll.u32 %s5339_s12, 4  ;;  %s5985_s1 = sld [smem:[#allocation19_spill]]  ;;  %s235_s13 = int_to_ptr.vmem [resolvable:$true] %s5437_s13 }
  0x10   : > { %s5983_s8 = scalar_select %p5422_p3, 1, 0 }
  0x11   : > { %p4565_p5 = pneg %p5422_p3 }
  0x13   : > { %p5431_p6 = pnand %p4565_p5, %p5977_p1 }
  0x15   : > { %s5087_s16 = scalar_lea.hbm %s5985_s1, 256  ;;  %p5447_p8 = pneg %p5431_p6 }
  0x16   : > { %p5088_p7 = scmp.ne.s32.totalorder %s5985_s1, %s5087_s16  ;;  %p5094_p11 = scmp.lt.u32.totalorder %s5087_s16, %s5985_s1 }
  0x18   : > { %p5090_p9 = pnand %p5447_p8, %p5088_p7 }
  0x1a   : > { %p5091_p10 = pneg %p5090_p9 }
  0x1c   : > { %p5096_p12 = pnand %p5094_p11, %p5091_p10 }
  0x1e   : > { %5099 = shalt.err (!%p5096_p12)
}
  0x1f   : > { %s5100_s22 = scalar_lea.vmem %s5420_s29, 256  ;;  %p5108_p5 = scmp.lt.s32.totalorder %s5420_s29, %s5420_s29 }
  0x20   : > { %p5101_p13 = scmp.ne.s32.totalorder %s5420_s29, %s5100_s22  ;;  %p5109_p4 = scmp.lt.s32.totalorder %s5100_s22, %s5100_s22 }
  0x22   : > { %p5103_p0 = pnand %p5101_p13, %p5447_p8  ;;  %p5110_p7 = por %p5109_p4, %p5108_p5 }
  0x24   : > { %p5104_p2 = pneg %p5103_p0 }
  0x26   : > { %p5111_p9 = pnand %p5110_p7, %p5104_p2 }
  0x28   : > { %5114 = shalt.err (!%p5111_p9)
}
  0x29   : > { %s5340_s23 = smov 128   ;;  %s5341_s28 = smov 8  }
  0x2a   : > { %4568 = dma.hbm_to_vmem [thread:$0]  (!%p5431_p6), %s5985_s1, 256, %s5420_s29, [#allocation6], %s5340_s23, %s5340_s23, %s5341_s28  }
  0x2b   : > { %s5115_s16 = scalar_lea.hbm %s5972_s3, 9216 }
  0x2c   : > { %p5116_p4 = scmp.ne.s32.totalorder %s5972_s3, %s5115_s16  ;;  %p5122_p12 = scmp.lt.u32.totalorder %s5115_s16, %s5972_s3 }
  0x2e   : > { %p5118_p10 = pnand %p5116_p4, %p5447_p8 }
  0x30   : > { %p5119_p11 = pneg %p5118_p10 }
  0x32   : > { %p5124_p13 = pnand %p5122_p12, %p5119_p11 }
  0x34   : > { %5127 = shalt.err (!%p5124_p13)
}
  0x35   : > { %s5128_s29 = scalar_lea.vmem %s5435_s11, 9216  ;;  %p5136_p7 = scmp.lt.s32.totalorder %s5435_s11, %s5435_s11 }
  0x36   : > { %p5129_p0 = scmp.ne.s32.totalorder %s5435_s11, %s5128_s29  ;;  %p5137_p9 = scmp.lt.s32.totalorder %s5128_s29, %s5128_s29 }
  0x38   : > { %p5131_p2 = pnand %p5129_p0, %p5447_p8  ;;  %p5138_p4 = por %p5137_p9, %p5136_p7 }
  0x3a   : > { %p5132_p5 = pneg %p5131_p2 }
  0x3c   : > { %p5139_p10 = pnand %p5138_p4, %p5132_p5 }
  0x3e   : > { %5142 = shalt.err (!%p5139_p10)
}
  0x3f   : > { %s5979_s22 = smov 192   ;;  %s5980_s23 = smov 12  }
  0x40   : > { %4574 = dma.hbm_to_vmem [thread:$0]  (!%p5431_p6), %s5972_s3, 9216, %s5435_s11, [#allocation9], %s5979_s22, %s5979_s22, %s5980_s23  }
  0x41   : > { %s5143_s15 = scalar_lea.hbm %s5971_s2, 9216 }
  0x42   : > { %p5144_p11 = scmp.ne.s32.totalorder %s5971_s2, %s5143_s15  ;;  %p5150_p0 = scmp.lt.u32.totalorder %s5143_s15, %s5971_s2 }
  0x44   : > { %p5146_p12 = pnand %p5144_p11, %p5447_p8 }
  0x46   : > { %p5147_p13 = pneg %p5146_p12 }
  0x48   : > { %p5152_p2 = pnand %p5150_p0, %p5147_p13 }
  0x4a   : > { %5155 = shalt.err (!%p5152_p2)
}
  0x4b   : > { %s5156_s21 = scalar_lea.vmem %s235_s13, 9216  ;;  %p5164_p4 = scmp.lt.s32.totalorder %s235_s13, %s235_s13 }
  0x4c   : > { %p5157_p5 = scmp.ne.s32.totalorder %s235_s13, %s5156_s21  ;;  %p5165_p10 = scmp.lt.s32.totalorder %s5156_s21, %s5156_s21 }
  0x4e   : > { %p5159_p7 = pnand %p5157_p5, %p5447_p8  ;;  %p5166_p1 = por %p5165_p10, %p5164_p4 }
  0x50   : > { %p5160_p9 = pneg %p5159_p7 }
  0x52   : > { %p5167_p3 = pnand %p5166_p1, %p5160_p9 }
  0x54   : > { %5170 = shalt.err (!%p5167_p3)
}
  0x55   : > { %4571 = dma.hbm_to_vmem [thread:$0]  (!%p5431_p6), %s5971_s2, 9216, %s235_s13, [#allocation6], %s5979_s22, %s5979_s22, %s5980_s23  }
  0x56   : > { %s5344_s28 = smov [#allocation10]   ;;  %s5345_s12 = smov [#allocation11]  }
  0x57   : > { %s260_s10 = sshll.u32 %s5344_s28, 4  ;;  %s273_s14 = sshll.u32 %s5345_s12, 4  ;;  %s261_s10 = int_to_ptr.vmem [resolvable:$true] %s260_s10  ;;  %s274_s14 = int_to_ptr.vmem [resolvable:$true] %s273_s14 }
  0x58   : > { %s5171_s17 = scalar_lea.hbm %s5973_s4, 9216 }
  0x59   : > { %p5172_p1 = scmp.ne.s32.totalorder %s5973_s4, %s5171_s17  ;;  %p5178_p12 = scmp.lt.u32.totalorder %s5171_s17, %s5973_s4 }
  0x5b   : > { %p5174_p3 = pnand %p5172_p1, %p5447_p8 }
  0x5d   : > { %p5175_p11 = pneg %p5174_p3 }
  0x5f   : > { %p5180_p13 = pnand %p5178_p12, %p5175_p11 }
  0x61   : > { %5183 = shalt.err (!%p5180_p13)
}
  0x62   : > { %s5184_s13 = scalar_lea.vmem %s261_s10, 9216  ;;  %p5192_p7 = scmp.lt.s32.totalorder %s261_s10, %s261_s10 }
  0x63   : > { %p5185_p0 = scmp.ne.s32.totalorder %s261_s10, %s5184_s13  ;;  %p5193_p9 = scmp.lt.s32.totalorder %s5184_s13, %s5184_s13 }
  0x65   : > { %p5187_p2 = pnand %p5185_p0, %p5447_p8  ;;  %p5194_p4 = por %p5193_p9, %p5192_p7 }
  0x67   : > { %p5188_p5 = pneg %p5187_p2 }
  0x69   : > { %p5195_p10 = pnand %p5194_p4, %p5188_p5 }
  0x6b   : > { %5198 = shalt.err (!%p5195_p10)
}
  0x6c   : > { %4577 = dma.hbm_to_vmem [thread:$0]  (!%p5431_p6), %s5973_s4, 9216, %s261_s10, [#allocation9], %s5979_s22, %s5979_s22, %s5980_s23  }
  0x6d   : > { %s5199_s16 = scalar_lea.hbm %s5974_s5, 9216 }
  0x6e   : > { %p5200_p1 = scmp.ne.s32.totalorder %s5974_s5, %s5199_s16  ;;  %p5206_p12 = scmp.lt.u32.totalorder %s5199_s16, %s5974_s5 }
  0x70   : > { %p5202_p3 = pnand %p5200_p1, %p5447_p8 }
  0x72   : > { %p5203_p11 = pneg %p5202_p3 }
  0x74   : > { %p5208_p13 = pnand %p5206_p12, %p5203_p11 }
  0x76   : > { %5211 = shalt.err (!%p5208_p13)
}
  0x77   : > { %s5212_s11 = scalar_lea.vmem %s274_s14, 9216  ;;  %p5220_p7 = scmp.lt.s32.totalorder %s274_s14, %s274_s14 }
  0x78   : > { %p5213_p0 = scmp.ne.s32.totalorder %s274_s14, %s5212_s11  ;;  %p5221_p9 = scmp.lt.s32.totalorder %s5212_s11, %s5212_s11 }
  0x7a   : > { %p5215_p2 = pnand %p5213_p0, %p5447_p8  ;;  %p5222_p4 = por %p5221_p9, %p5220_p7 }
  0x7c   : > { %p5216_p5 = pneg %p5215_p2 }
  0x7e   : > { %p5223_p10 = pnand %p5222_p4, %p5216_p5 }
  0x80   : > { %5226 = shalt.err (!%p5223_p10)
}
  0x81   : > { %4580 = dma.hbm_to_vmem [thread:$0]  (!%p5431_p6), %s5974_s5, 9216, %s274_s14, [#allocation12], %s5979_s22, %s5979_s22, %s5980_s23  }
  0x82   : > { %s3895_s9 = sadd.s32 4294967294, %s5335_s27   ;;  %s5560_s19 = sadd.s32 1, %s5335_s27  }
  0x83   : > { %s33_s29 = sadd.s32 1, %s5331_s26  ;;  %s30_s28 = ssub.s32 %s5335_s27, %s5560_s19 }
  0x84   : > { %p40_p8 = scmp.ne.s32.totalorder %s5331_s26, %s5327_s25  ;;  %p31_p1 = scmp.eq.s32.totalorder %s30_s28, 0 }
  0x85   : > { %p41_p3 = scmp.eq.s32.totalorder %s5335_s27, 0  ;;  %p46_p11 = scmp.ne.s32.totalorder %s5327_s25, %s5323_s24 }
  0x86   : > { %p196_p12 = scmp.eq.s32.totalorder %s5415_s30, 1  ;;  %p5987_p0 = scmp.eq.s32.totalorder %s5415_s30, 0 }
  0x87   : > { %s5572_s12 = scalar_select %p31_p1, %s5331_s26, %s33_s29  }
  0x88   : > { %p42_p13 = por %p41_p3, %p40_p8  ;;  %p5576_p2 = por %p5987_p0, %p46_p11 }
  0x89   : > { %p5580_p6 = por %p196_p12, %p40_p8  ;;  %p202_p5 = scmp.eq.s32.totalorder %s3895_s9, 1 }
  0x8a   : > { %p4594_p7 = scmp.lt.s32.totalorder %s5335_s27, 2  ;;  %s290_s16 = sand.u32 1, %s5331_s26  }
  0x8b   : > { %s5989_s14 = scalar_select %p5580_p6, 1, 0 }
  0x8c   : > { %p5586_p9 = por %p202_p5, %p46_p11  ;;  %s4536_s18 = smul.u32 24, %s290_s16 }
  0x8d   : > { %p5590_p4 = pnand %p4594_p7, %p42_p13  ;;  %s4537_s21 = smul.u32 384, %s5335_s27 }
  0x8e   : > { %s5990_s17 = scalar_select %p5586_p9, 1, 0 }
  0x8f   : > { %s5598_s13 = scalar_lea.hbm %s5969_s0, %s4537_s21  ;;  %s294_s9 = scalar_lea.vmem [#allocation2], %s4536_s18 }
  0x90   : > { %s301_s29 = sshll.u32 %s294_s9, 4  ;;  %s5602_s28 = scalar_lea.sflag [#allocation3], %s290_s16  ;;  %s5600_s29 = int_to_ptr.vmem [resolvable:$true] %s301_s29 }
  0x91   : > { %s5227_s22 = scalar_lea.hbm %s5598_s13, 384  ;;  %p5229_p8 = pneg %p5590_p4 }
  0x92   : > { %p5228_p10 = scmp.ne.s32.totalorder %s5598_s13, %s5227_s22  ;;  %s5232_s10 = scalar_lea.hbm %s5969_s0, 768 }
  0x93   : > { %p5233_p11 = scmp.lt.u32.totalorder %s5598_s13, %s5969_s0  ;;  %p5234_p12 = scmp.lt.u32.totalorder %s5232_s10, %s5227_s22 }
  0x94   : > { %p5230_p1 = pnand %p5229_p8, %p5228_p10  ;;  %p5236_p0 = scmp.lt.u32.totalorder %s5227_s22, %s5598_s13 }
  0x95   : > { %p5235_p13 = por %p5234_p12, %p5233_p11 }
  0x96   : > { %p5231_p3 = pneg %p5230_p1 }
  0x97   : > { %p5237_p5 = por %p5236_p0, %p5235_p13 }
  0x99   : > { %p5238_p7 = pnand %p5237_p5, %p5231_p3 }
  0x9b   : > { %5241 = shalt.err (!%p5238_p7)
}
  0x9c   : > { %s5242_s16 = scalar_lea.vmem %s5600_s29, 384  ;;  %s5346_s18 = smov [#allocation2]  }
  0x9d   : > { %p5243_p10 = scmp.ne.s32.totalorder %s5600_s29, %s5242_s16  ;;  %s5247_s9 = sshll.u32 %s5346_s18, 4  ;;  %s5248_s9 = int_to_ptr.vmem [resolvable:$false] %s5247_s9 }
  0x9e   : > { %s5249_s1 = scalar_lea.vmem %s5248_s9, 768  ;;  %p5250_p6 = scmp.lt.s32.totalorder %s5600_s29, %s5248_s9 }
  0x9f   : > { %p5245_p1 = pnand %p5243_p10, %p5229_p8  ;;  %p5251_p11 = scmp.lt.s32.totalorder %s5249_s1, %s5242_s16 }
  0xa1   : > { %p5246_p9 = pneg %p5245_p1  ;;  %p5252_p12 = por %p5251_p11, %p5250_p6 }
  0xa3   : > { %p5253_p13 = pnand %p5252_p12, %p5246_p9 }
  0xa5   : > { %5256 = shalt.err (!%p5253_p13)
}
  0xa6   : > { %s5992_s22 = smov 12   ;;  %s5993_s23 = smov 192  }
  0xa7   : > { %4584 = dma.hbm_to_vmem [thread:$0]  (!%p5590_p4), %s5598_s13, 384, %s5600_s29, %s5602_s28, %s5993_s23, %s5993_s23, %s5992_s22  }
  0xa8   : > { %p5994_p8 = scmp.ne.s32.totalorder %s5983_s8, 0 }
  0xa9   : > { %s5636_s21 = sand.u32 (!%p5994_p8), 1, %s5327_s25  }
  0xaa   : > { %313 = sbr.rel (%p5994_p8) target bundleno = 3330 (0xd02), region = 48  ;;  %s316_s10 = scalar_lea.sflag (!%p5994_p8), [#allocation3], %s5636_s21 }
  0xab   : > { %s4538_s11 = smul.u32 (!%p5994_p8), 24, %s5636_s21 }
  0xad   : > { %s5640_s16 = scalar_lea.vmem (!%p5994_p8), [#allocation2], %s4538_s11 }
  0xb1   : > { %5302 = dma.done.wait (%p5576_p2), %s316_s10, 384  }
  0xb2   : > { %5304 = vsyncadd (%p5576_p2), %s316_s10, 4294966912  ;;  %p5995_p6 = scmp.eq.s32.totalorder %s5415_s30, 0 }
  0xb4   : > { %5306 = dma.done.wait (%p5995_p6), [#allocation6], 9472   ;;  %p5996_p9 = pmov %p5995_p6 }
  0xb5   : > { %p5997_p4 = pmov %p5995_p6 }
  0xb6   : > { %5308 = vsyncadd (%p5996_p9), [#allocation6], 4294957824 }
  0xb7   : > { %5310 = dma.done.wait (%p5997_p4), [#allocation9], 18432   ;;  %p5998_p3 = pmov %p5997_p4 }
  0xb9   : > { %5312 = vsyncadd (%p5998_p3), [#allocation9], 4294948864  ;;  %p5999_p0 = pmov %p5998_p3 }
  0xbb   : > { %5314 = dma.done.wait (%p5999_p0), [#allocation12], 9216   ;;  %p6000_p5 = pmov %p5999_p0 }
  0xbc   : > { %v4648_v0 = vld [vmem:[#allocation7 + $0x4] ss:$12 sps:$4 sm:$0xff]   ;;  %v4650_v1 = vld [vmem:[#allocation7 + $0xc8] ss:$12 sps:$4 sm:$0xff]   ;;  %v4651_v2 = vld [vmem:[#allocation7] ss:$12 sps:$4 sm:$0xff]  }
  0xbd   : > { %5316 = vsyncadd (%p6000_p5), [#allocation12], 4294958080  ;;  %871 = vmatprep.subr.bf16.mxu0 %v4648_v0  ;;  %4216 = vmatprep.subr.bf16.mxu1 %v4650_v1  ;;  %v4652_v3 = vld [vmem:[#allocation7 + $0x8] ss:$12 sps:$4 sm:$0xff]   ;;  %v4655_v5 = vld [vmem:[#allocation7 + $0xe0] ss:$12 sps:$4 sm:$0xff]  }
  0xbe   : > { %872 = vmatpush1.bf16.msra.mxu0 %v4651_v2  ;;  %v4653_v4 = vld [vmem:[#allocation7 + $0x1c] ss:$12 sps:$4 sm:$0xff]   ;;  %4217 = vmatpush3.bf16.msra.mxu1 %v4652_v3  ;;  %v4656_v6 = vld [vmem:[#allocation7 + $0x18] ss:$12 sps:$4 sm:$0xff]   ;;  %v4657_v7 = vld [vmem:[#allocation7 + $0x20] ss:$12 sps:$4 sm:$0xff]  }
  0xbf   : > { %873 = vmatprep.subr.bf16.mxu0 %v4653_v4  ;;  %4218 = vmatprep.subr.bf16.mxu1 %v4655_v5  ;;  %v4658_v8 = vld [vmem:[#allocation7 + $0x34] ss:$12 sps:$4 sm:$0xff]   ;;  %v4660_v9 = vld [vmem:[#allocation7 + $0xf8] ss:$12 sps:$4 sm:$0xff]   ;;  %v4661_v10 = vld [vmem:[#allocation7 + $0x30] ss:$12 sps:$4 sm:$0xff]  }
  0xc0   : > { %v4662_v11 = vld [vmem:[#allocation7 + $0x38] ss:$12 sps:$4 sm:$0xff]   ;;  %v4665_v13 = vld [vmem:[#allocation7 + $0x110] ss:$12 sps:$4 sm:$0xff]   ;;  %v4666_v14 = vld [vmem:[#allocation7 + $0x48] ss:$12 sps:$4 sm:$0xff]  }
  0xc1   : > { %v4663_v12 = vld [vmem:[#allocation7 + $0x4c] ss:$12 sps:$4 sm:$0xff]   ;;  %v4667_v15 = vld [vmem:[#allocation7 + $0x50] ss:$12 sps:$4 sm:$0xff]   ;;  %v4670_v17 = vld [vmem:[#allocation7 + $0x128] ss:$12 sps:$4 sm:$0xff]  }
  0xc2   : > { %874 = vmatpush1.bf16.msra.mxu0 %v4656_v6  ;;  %4219 = vmatpush3.bf16.msra.mxu1 %v4657_v7  ;;  %v4668_v16 = vld [vmem:[#allocation7 + $0x64] ss:$12 sps:$4 sm:$0xff]   ;;  %v4671_v18 = vld [vmem:[#allocation7 + $0x60] ss:$12 sps:$4 sm:$0xff]   ;;  %v4672_v19 = vld [vmem:[#allocation7 + $0x68] ss:$12 sps:$4 sm:$0xff]  }
  0xc3   : > { %875 = vmatprep.subr.bf16.mxu0 %v4658_v8  ;;  %4220 = vmatprep.subr.bf16.mxu1 %v4660_v9  ;;  %v4673_v20 = vld [vmem:[#allocation7 + $0x7c] ss:$12 sps:$4 sm:$0xff]   ;;  %v4675_v21 = vld [vmem:[#allocation7 + $0x140] ss:$12 sps:$4 sm:$0xff]   ;;  %v4676_v22 = vld [vmem:[#allocation7 + $0x78] ss:$12 sps:$4 sm:$0xff]  }
  0xc4   : > { %v4677_v23 = vld [vmem:[#allocation7 + $0x80] ss:$12 sps:$4 sm:$0xff]   ;;  %v4680_v25 = vld [vmem:[#allocation7 + $0x158] ss:$12 sps:$4 sm:$0xff]   ;;  %v4681_v26 = vld [vmem:[#allocation7 + $0x90] ss:$12 sps:$4 sm:$0xff]  }
  0xc5   : > { %v4678_v24 = vld [vmem:[#allocation7 + $0x94] ss:$12 sps:$4 sm:$0xff]   ;;  %v4682_v27 = vld [vmem:[#allocation7 + $0x98] ss:$12 sps:$4 sm:$0xff]   ;;  %v4685_v29 = vld [vmem:[#allocation7 + $0x170] ss:$12 sps:$4 sm:$0xff]  }
  0xc6   : > { %876 = vmatpush1.bf16.msra.mxu0 %v4661_v10  ;;  %4221 = vmatpush3.bf16.msra.mxu1 %v4662_v11  ;;  %v4683_v28 = vld [vmem:[#allocation7 + $0xac] ss:$12 sps:$4 sm:$0xff]   ;;  %v5659_v30 = vld [vmem:[%s5640_s16 + $0x4] ss:$12 sps:$4 sm:$0xff]   ;;  %v5347_v38 = vmov 0.0   ;;  %vm5348_vm0 = vmmov 0  }
  0xc7   : > { %877 = vmatprep.subr.bf16.mxu0 %v4663_v12  ;;  %4222 = vmatprep.subr.bf16.mxu1 %v4665_v13  ;;  %v4686_v31 = vld [vmem:[#allocation7 + $0xa8] ss:$12 sps:$4 sm:$0xff]   ;;  %v4687_v32 = vld [vmem:[#allocation7 + $0xb0] ss:$12 sps:$4 sm:$0xff]   ;;  %v5663_v34 = vld [vmem:[%s5640_s16] ss:$12 sps:$4 sm:$0xff]  }
  0xc8   : > { %v4690_v33 = vld [vmem:[#allocation7 + $0xc4] ss:$12 sps:$4 sm:$0xff]   ;;  %989 = vmatprep.mubr.bf16.mxu1 %v5659_v30  ;;  %903 = vmatprep.mubr.bf16.mxu0 %v5659_v30  ;;  %v4693_v35 = vld [vmem:[#allocation7 + $0xc0] ss:$12 sps:$4 sm:$0xff]   ;;  %v4694_v36 = vld [vmem:[#allocation7 + $0x188] ss:$12 sps:$4 sm:$0xff]  }
  0xc9   : > { %v4695_v37 = vld [vmem:[#allocation7 + $0xdc] ss:$12 sps:$4 sm:$0xff]   ;;  %v4697_v39 = vld [vmem:[#allocation7 + $0xd8] ss:$12 sps:$4 sm:$0xff]   ;;  %v4698_v40 = vld [vmem:[#allocation7 + $0x1a0] ss:$12 sps:$4 sm:$0xff]  }
  0xca   : > { %878 = vmatpush1.bf16.msra.mxu0 %v4666_v14  ;;  %4223 = vmatpush3.bf16.msra.mxu1 %v4667_v15  ;;  %v4699_v41 = vld [vmem:[#allocation7 + $0xf4] ss:$12 sps:$4 sm:$0xff]   ;;  %v4701_v42 = vld [vmem:[#allocation7 + $0xf0] ss:$12 sps:$4 sm:$0xff]   ;;  %v4702_v43 = vld [vmem:[#allocation7 + $0x1b8] ss:$12 sps:$4 sm:$0xff]  }
  0xcb   : > { %879 = vmatprep.subr.bf16.mxu0 %v4668_v16  ;;  %4224 = vmatprep.subr.bf16.mxu1 %v4670_v17  ;;  %v4703_v44 = vld [vmem:[#allocation7 + $0x10c] ss:$12 sps:$4 sm:$0xff]   ;;  %v4705_v45 = vld [vmem:[#allocation7 + $0x108] ss:$12 sps:$4 sm:$0xff]   ;;  %v4706_v46 = vld [vmem:[#allocation7 + $0x1d0] ss:$12 sps:$4 sm:$0xff]  }
  0xcc   : > { %v4707_v47 = vld [vmem:[#allocation7 + $0x124] ss:$12 sps:$4 sm:$0xff]   ;;  %v4709_v48 = vld [vmem:[#allocation7 + $0x120] ss:$12 sps:$4 sm:$0xff]   ;;  %v4710_v49 = vld [vmem:[#allocation7 + $0x1e8] ss:$12 sps:$4 sm:$0xff]  }
  0xcd   : > { %v4711_v50 = vld [vmem:[#allocation7 + $0x13c] ss:$12 sps:$4 sm:$0xff]   ;;  %v4713_v51 = vld [vmem:[#allocation7 + $0x138] ss:$12 sps:$4 sm:$0xff]   ;;  %v4714_v52 = vld [vmem:[#allocation7 + $0x200] ss:$12 sps:$4 sm:$0xff]  }
  0xce   : > { %880 = vmatpush1.bf16.msra.mxu0 %v4671_v18  ;;  %4225 = vmatpush3.bf16.msra.mxu1 %v4672_v19  ;;  %v4715_v53 = vld [vmem:[#allocation7 + $0x154] ss:$12 sps:$4 sm:$0xff]   ;;  %v4717_v54 = vld [vmem:[#allocation7 + $0x150] ss:$12 sps:$4 sm:$0xff]   ;;  %v4718_v55 = vld [vmem:[#allocation7 + $0x218] ss:$12 sps:$4 sm:$0xff]  }
  0xcf   : > { %881 = vmatprep.subr.bf16.mxu0 %v4673_v20  ;;  %4226 = vmatprep.subr.bf16.mxu1 %v4675_v21  ;;  %v4719_v56 = vld [vmem:[#allocation7 + $0x16c] ss:$12 sps:$4 sm:$0xff]   ;;  %v4721_v57 = vld [vmem:[#allocation7 + $0x168] ss:$12 sps:$4 sm:$0xff]   ;;  %v4722_v58 = vld [vmem:[#allocation7 + $0x230] ss:$12 sps:$4 sm:$0xff]  }
  0xd0   : > { %v4725_v59 = vld [vmem:[#allocation7 + $0x184] ss:$12 sps:$4 sm:$0xff]   ;;  %v4723_v61 = vld [vmem:[#allocation7 + $0x180] ss:$12 sps:$4 sm:$0xff]   ;;  %v4732_v0 = vld [vmem:[#allocation7 + $0x19c] ss:$12 sps:$4 sm:$0xff]  }
  0xd1   : > { %v4729_v60 = vld [vmem:[#allocation8 + $0x4] ss:$12 sps:$4 sm:$0xff]   ;;  %v5678_v62 = vld [vmem:[%s5640_s16 + $0x8] ss:$12 sps:$4 sm:$0xff]   ;;  %v5349_v6 = vmov 0   ;;  %vm2346_vm1 = vcmask 523264  }
  0xd2   : > { %882 = vmatpush1.bf16.msra.mxu0 %v4676_v22  ;;  %4227 = vmatpush3.bf16.msra.mxu1 %v4677_v23  ;;  %v4727_v63 = vld [vmem:[#allocation8] ss:$12 sps:$4 sm:$0xff]   ;;  %v4735_v1 = vld [vmem:[#allocation8 + $0x1c] ss:$12 sps:$4 sm:$0xff]   ;;  %v4730_v2 = vld [vmem:[#allocation7 + $0x198] ss:$12 sps:$4 sm:$0xff]  }
  0xd3   : > { %883 = vmatprep.subr.bf16.mxu0 %v4678_v24  ;;  %4228 = vmatprep.subr.bf16.mxu1 %v4680_v25  ;;  %v4733_v3 = vld [vmem:[#allocation8 + $0x18] ss:$12 sps:$4 sm:$0xff]   ;;  %v4738_v4 = vld [vmem:[#allocation7 + $0x1b4] ss:$12 sps:$4 sm:$0xff]   ;;  %v4736_v7 = vld [vmem:[#allocation7 + $0x1b0] ss:$12 sps:$4 sm:$0xff]  }
  0xd4   : > { %v4741_v5 = vld [vmem:[#allocation8 + $0x34] ss:$12 sps:$4 sm:$0xff]   ;;  %v4739_v8 = vld [vmem:[#allocation8 + $0x30] ss:$12 sps:$4 sm:$0xff]   ;;  %v4744_v9 = vld [vmem:[#allocation7 + $0x1cc] ss:$12 sps:$4 sm:$0xff]  }
  0xd5   : > { %v4747_v10 = vld [vmem:[#allocation8 + $0x4c] ss:$12 sps:$4 sm:$0xff]   ;;  %v4742_v11 = vld [vmem:[#allocation7 + $0x1c8] ss:$12 sps:$4 sm:$0xff]   ;;  %v4750_v13 = vld [vmem:[#allocation7 + $0x1e4] ss:$12 sps:$4 sm:$0xff]  }
  0xd6   : > { %884 = vmatpush1.bf16.msra.mxu0 %v4681_v26  ;;  %4229 = vmatpush3.bf16.msra.mxu1 %v4682_v27  ;;  %v4745_v12 = vld [vmem:[#allocation8 + $0x48] ss:$12 sps:$4 sm:$0xff]   ;;  %v4753_v14 = vld [vmem:[#allocation8 + $0x64] ss:$12 sps:$4 sm:$0xff]   ;;  %v4748_v15 = vld [vmem:[#allocation7 + $0x1e0] ss:$12 sps:$4 sm:$0xff]  }
  0xd7   : > { %885 = vmatprep.subr.bf16.mxu0 %v4683_v28  ;;  %4230 = vmatprep.subr.bf16.mxu1 %v4685_v29  ;;  %v4751_v16 = vld [vmem:[#allocation8 + $0x60] ss:$12 sps:$4 sm:$0xff]   ;;  %v4756_v17 = vld [vmem:[#allocation7 + $0x1fc] ss:$12 sps:$4 sm:$0xff]   ;;  %v4754_v19 = vld [vmem:[#allocation7 + $0x1f8] ss:$12 sps:$4 sm:$0xff]  }
  0xd8   : > { %v4759_v18 = vld [vmem:[#allocation8 + $0x7c] ss:$12 sps:$4 sm:$0xff]   ;;  %v4757_v20 = vld [vmem:[#allocation8 + $0x78] ss:$12 sps:$4 sm:$0xff]   ;;  %v4762_v21 = vld [vmem:[#allocation7 + $0x214] ss:$12 sps:$4 sm:$0xff]  }
  0xd9   : > { %v4765_v22 = vld [vmem:[#allocation8 + $0x94] ss:$12 sps:$4 sm:$0xff]   ;;  %v4760_v23 = vld [vmem:[#allocation7 + $0x210] ss:$12 sps:$4 sm:$0xff]   ;;  %v4768_v25 = vld [vmem:[#allocation7 + $0x22c] ss:$12 sps:$4 sm:$0xff]  }
  0xda   : > { %886 = vmatpush1.bf16.msra.mxu0 %v4686_v31  ;;  %4231 = vmatpush3.bf16.msra.mxu1 %v4687_v32  ;;  %v4763_v24 = vld [vmem:[#allocation8 + $0x90] ss:$12 sps:$4 sm:$0xff]   ;;  %v4771_v26 = vld [vmem:[#allocation8 + $0xac] ss:$12 sps:$4 sm:$0xff]   ;;  %v4766_v27 = vld [vmem:[#allocation7 + $0x228] ss:$12 sps:$4 sm:$0xff]  }
  0xdb   : > { %887 = vmatprep.subr.bf16.mxu0 %v4690_v33  ;;  %4364 = vmatprep.subr.bf16.mxu1 %v5347_v38  ;;  %v4769_v28 = vld [vmem:[#allocation8 + $0xa8] ss:$12 sps:$4 sm:$0xff]   ;;  %v4774_v31 = vld [vmem:[#allocation8 + $0xc4] ss:$12 sps:$4 sm:$0xff]   ;;  %v4772_v32 = vld [vmem:[#allocation8 + $0xc0] ss:$12 sps:$4 sm:$0xff]  }
  0xdc   : > { %v4775_v29 = vld [vmem:[#allocation8 + $0xc8] ss:$12 sps:$4 sm:$0xff]   ;;  %vm2394_vm2 = vcmask 130048   ;;  %s5350_s8 = smov 64   ;;  %s4539_s13 = smul.u32 48, %s5636_s21 }
  0xdd   : > { %990 = vmatmul.mubr.bf16.vlgmr.msra.gmra.mrb[0].mxu1 %v5663_v34  ;;  %v4776_v33 = vld [vmem:[#allocation8 + $0x8] ss:$12 sps:$4 sm:$0xff]   ;;  %s4540_s18 = smul.u32 768, %s5415_s30  ;;  %s3761_s22 = scalar_lea.sflag [#allocation4], %s5636_s21 }
  0xde   : > { %888 = vmatpush1.bf16.msra.mxu0 %v4693_v35  ;;  %4365 = vmatpush3.bf16.msra.mxu1 %v4694_v36  ;;  %v4780_v35 = vld [vmem:[#allocation8 + $0xe0] ss:$12 sps:$4 sm:$0xff]   ;;  %v4779_v36 = vld [vmem:[#allocation8 + $0xdc] ss:$12 sps:$4 sm:$0xff]   ;;  %s369_s29 = scalar_lea.vmem [#allocation13], %s4539_s13  ;;  %p6001_p7 = scmp.ne.s32.totalorder %s5989_s14, 0 }
  0xdf   : > { %889 = vmatprep.subr.bf16.mxu0 %v4695_v37  ;;  %4366 = vmatprep.subr.bf16.mxu1 %v5347_v38  ;;  %v4781_v37 = vld [vmem:[#allocation8 + $0x20] ss:$12 sps:$4 sm:$0xff]   ;;  %s3774_s28 = sshll.u32 %s369_s29, 4  ;;  %s5925_s1 = scalar_lea.hbm %s5976_s7, %s4540_s18  ;;  %s5920_s28 = int_to_ptr.vmem [resolvable:$true] %s3774_s28 }
  0xe0   : > { %4380 = vmatprep.mubr.msk.bf16.mxu1 %vm5348_vm0, %v5347_v38  ;;  %s5257_s23 = scalar_lea.vmem %s5920_s28, 768  ;;  %s5351_s11 = smov [#allocation13]  }
  0xe1   : > { %p5258_p2 = scmp.ne.s32.totalorder %s5920_s28, %s5257_s23  ;;  %s5261_s10 = sshll.u32 %s5351_s11, 4  ;;  %s5262_s10 = int_to_ptr.vmem [resolvable:$false] %s5261_s10 }
  0xe2   : > { %890 = vmatpush1.bf16.msra.mxu0 %v4697_v39  ;;  %4367 = vmatpush3.bf16.msra.mxu1 %v4698_v40  ;;  %v4777_v39 = vld [vmem:[#allocation8 + $0xd8] ss:$12 sps:$4 sm:$0xff]   ;;  %p5264_p11 = scmp.lt.s32.totalorder %s5920_s28, %s5262_s10 }
  0xe3   : > { %891 = vmatprep.subr.bf16.mxu0 %v4699_v41  ;;  %4368 = vmatprep.subr.bf16.mxu1 %v5347_v38  ;;  %v4785_v40 = vld [vmem:[#allocation8 + $0xf8] ss:$12 sps:$4 sm:$0xff]   ;;  %v4784_v41 = vld [vmem:[#allocation8 + $0xf4] ss:$12 sps:$4 sm:$0xff]   ;;  %p5259_p10 = pnand %p5258_p2, %p6001_p7 }
  0xe5   : > { %p5260_p1 = pneg %p5259_p10 }
  0xe6   : > { %892 = vmatpush1.bf16.msra.mxu0 %v4701_v42  ;;  %4369 = vmatpush3.bf16.msra.mxu1 %v4702_v43  ;;  %v4782_v42 = vld [vmem:[#allocation8 + $0xf0] ss:$12 sps:$4 sm:$0xff]   ;;  %v4786_v43 = vld [vmem:[#allocation8 + $0x38] ss:$12 sps:$4 sm:$0xff]  }
  0xe7   : > { %893 = vmatprep.subr.bf16.mxu0 %v4703_v44  ;;  %4370 = vmatprep.subr.bf16.mxu1 %v5347_v38  ;;  %v4790_v44 = vld [vmem:[#allocation8 + $0x110] ss:$12 sps:$4 sm:$0xff]  }
  0xea   : > { %894 = vmatpush1.bf16.msra.mxu0 %v4705_v45  ;;  %4371 = vmatpush3.bf16.msra.mxu1 %v4706_v46  ;;  %v4789_v45 = vld [vmem:[#allocation8 + $0x10c] ss:$12 sps:$4 sm:$0xff]   ;;  %v4787_v46 = vld [vmem:[#allocation8 + $0x108] ss:$12 sps:$4 sm:$0xff]  }
  0xeb   : > { %895 = vmatprep.subr.bf16.mxu0 %v4707_v47  ;;  %4372 = vmatprep.subr.bf16.mxu1 %v5347_v38  ;;  %v4791_v47 = vld [vmem:[#allocation8 + $0x50] ss:$12 sps:$4 sm:$0xff]  }
  0xee   : > { %896 = vmatpush1.bf16.msra.mxu0 %v4709_v48  ;;  %4373 = vmatpush3.bf16.msra.mxu1 %v4710_v49  ;;  %v4794_v48 = vld [vmem:[#allocation8 + $0x124] ss:$12 sps:$4 sm:$0xff]   ;;  %v4792_v49 = vld [vmem:[#allocation8 + $0x120] ss:$12 sps:$4 sm:$0xff]  }
  0xef   : > { %897 = vmatprep.subr.bf16.mxu0 %v4711_v50  ;;  %4374 = vmatprep.subr.bf16.mxu1 %v5347_v38  ;;  %v4796_v50 = vld [vmem:[#allocation8 + $0x68] ss:$12 sps:$4 sm:$0xff]  }
  0xf2   : > { %898 = vmatpush1.bf16.msra.mxu0 %v4713_v51  ;;  %4375 = vmatpush3.bf16.msra.mxu1 %v4714_v52  ;;  %v4799_v51 = vld [vmem:[#allocation8 + $0x13c] ss:$12 sps:$4 sm:$0xff]   ;;  %v4800_v52 = vld [vmem:[#allocation8 + $0x140] ss:$12 sps:$4 sm:$0xff]  }
  0xf3   : > { %899 = vmatprep.subr.bf16.mxu0 %v4715_v53  ;;  %4376 = vmatprep.subr.bf16.mxu1 %v5347_v38  ;;  %v4801_v53 = vld [vmem:[#allocation8 + $0x80] ss:$12 sps:$4 sm:$0xff]  }
  0xf6   : > { %900 = vmatpush1.bf16.msra.mxu0 %v4717_v54  ;;  %4377 = vmatpush3.bf16.msra.mxu1 %v4718_v55  ;;  %v4797_v54 = vld [vmem:[#allocation8 + $0x138] ss:$12 sps:$4 sm:$0xff]  }
  0xf7   : > { %901 = vmatprep.subr.bf16.mxu0 %v4719_v56  ;;  %4378 = vmatprep.subr.bf16.mxu1 %v5347_v38  ;;  %v4805_v55 = vld [vmem:[#allocation8 + $0x158] ss:$12 sps:$4 sm:$0xff]   ;;  %v4804_v56 = vld [vmem:[#allocation8 + $0x154] ss:$12 sps:$4 sm:$0xff]  }
  0xfa   : > { %902 = vmatpush1.bf16.msra.mxu0 %v4721_v57  ;;  %4379 = vmatpush3.bf16.msra.mxu1 %v4722_v58  ;;  %v4806_v57 = vld [vmem:[#allocation8 + $0x98] ss:$12 sps:$4 sm:$0xff]   ;;  %v4802_v58 = vld [vmem:[#allocation8 + $0x150] ss:$12 sps:$4 sm:$0xff]  }
  0xfb   : > { %914 = vmatprep.subr.bf16.mxu0 %v4725_v59  ;;  %1519 = vmatprep.subr.bf16.mxu1 %v4729_v60  ;;  %v4810_v59 = vld [vmem:[#allocation8 + $0x170] ss:$12 sps:$4 sm:$0xff]   ;;  %v4809_v60 = vld [vmem:[#allocation8 + $0x16c] ss:$12 sps:$4 sm:$0xff]  }
  0xfd   : > { %904 = vmatmul.mubr.bf16.vlgmr.msra.gmra.mrb[0].mxu0 %v5663_v34  ;;  %4381 = vmatmul.mubr.bf16.vlgmr.msra.gmra.mrb[4].mxu1 %v5678_v62 }
  0xfe   : > { %915 = vmatpush1.bf16.msra.mxu0 %v4723_v61  ;;  %1520 = vmatpush1.bf16.msra.mxu1 %v4727_v63  ;;  %v4811_v61 = vld [vmem:[#allocation8 + $0xb0] ss:$12 sps:$4 sm:$0xff]   ;;  %v4807_v63 = vld [vmem:[#allocation8 + $0x168] ss:$12 sps:$4 sm:$0xff]  }
  0xff   : > { %916 = vmatprep.subr.bf16.mxu0 %v4732_v0  ;;  %1521 = vmatprep.subr.bf16.mxu1 %v4735_v1  ;;  %v4814_v0 = vld [vmem:[#allocation8 + $0x184] ss:$12 sps:$4 sm:$0xff]   ;;  %v4815_v1 = vld [vmem:[#allocation8 + $0x188] ss:$12 sps:$4 sm:$0xff]  }
 0x100   : > { %946 = vmatprep.mubr.bf16.mxu0 %v5349_v6  ;;  %1551 = vmatprep.mubr.bf16.mxu1 %v5659_v30 }
 0x102   : > { %917 = vmatpush1.bf16.msra.mxu0 %v4730_v2  ;;  %1522 = vmatpush1.bf16.msra.mxu1 %v4733_v3  ;;  %v4812_v2 = vld [vmem:[#allocation8 + $0x180] ss:$12 sps:$4 sm:$0xff]   ;;  %v4818_v3 = vld [vmem:[#allocation8 + $0x19c] ss:$12 sps:$4 sm:$0xff]  }
 0x103   : > { %918 = vmatprep.subr.bf16.mxu0 %v4738_v4  ;;  %1523 = vmatprep.subr.bf16.mxu1 %v4741_v5  ;;  %v4819_v4 = vld [vmem:[#allocation8 + $0x1a0] ss:$12 sps:$4 sm:$0xff]   ;;  %v4816_v5 = vld [vmem:[#allocation8 + $0x198] ss:$12 sps:$4 sm:$0xff]  }
 0x106   : > { %919 = vmatpush1.bf16.msra.mxu0 %v4736_v7  ;;  %1524 = vmatpush1.bf16.msra.mxu1 %v4739_v8  ;;  %v4822_v7 = vld [vmem:[#allocation8 + $0x1b4] ss:$12 sps:$4 sm:$0xff]   ;;  %v4823_v8 = vld [vmem:[#allocation8 + $0x1b8] ss:$12 sps:$4 sm:$0xff]  }
 0x107   : > { %920 = vmatprep.subr.bf16.mxu0 %v4744_v9  ;;  %1525 = vmatprep.subr.bf16.mxu1 %v4747_v10  ;;  %v4820_v9 = vld [vmem:[#allocation8 + $0x1b0] ss:$12 sps:$4 sm:$0xff]   ;;  %v4826_v10 = vld [vmem:[#allocation8 + $0x1cc] ss:$12 sps:$4 sm:$0xff]  }
 0x10a   : > { %921 = vmatpush1.bf16.msra.mxu0 %v4742_v11  ;;  %1526 = vmatpush1.bf16.msra.mxu1 %v4745_v12  ;;  %v4824_v11 = vld [vmem:[#allocation8 + $0x1c8] ss:$12 sps:$4 sm:$0xff]   ;;  %v4830_v12 = vld [vmem:[#allocation8 + $0x1e4] ss:$12 sps:$4 sm:$0xff]  }
 0x10b   : > { %922 = vmatprep.subr.bf16.mxu0 %v4750_v13  ;;  %1527 = vmatprep.subr.bf16.mxu1 %v4753_v14  ;;  %v4831_v13 = vld [vmem:[#allocation8 + $0x1e8] ss:$12 sps:$4 sm:$0xff]   ;;  %v4828_v14 = vld [vmem:[#allocation8 + $0x1e0] ss:$12 sps:$4 sm:$0xff]  }
 0x10e   : > { %923 = vmatpush1.bf16.msra.mxu0 %v4748_v15  ;;  %1528 = vmatpush1.bf16.msra.mxu1 %v4751_v16  ;;  %v4834_v15 = vld [vmem:[#allocation8 + $0x1fc] ss:$12 sps:$4 sm:$0xff]   ;;  %v4835_v16 = vld [vmem:[#allocation8 + $0x200] ss:$12 sps:$4 sm:$0xff]  }
 0x10f   : > { %924 = vmatprep.subr.bf16.mxu0 %v4756_v17  ;;  %1529 = vmatprep.subr.bf16.mxu1 %v4759_v18  ;;  %v4832_v17 = vld [vmem:[#allocation8 + $0x1f8] ss:$12 sps:$4 sm:$0xff]   ;;  %v4838_v18 = vld [vmem:[#allocation8 + $0x214] ss:$12 sps:$4 sm:$0xff]  }
 0x112   : > { %925 = vmatpush1.bf16.msra.mxu0 %v4754_v19  ;;  %1530 = vmatpush1.bf16.msra.mxu1 %v4757_v20  ;;  %v4836_v19 = vld [vmem:[#allocation8 + $0x210] ss:$12 sps:$4 sm:$0xff]   ;;  %v4839_v20 = vld [vmem:[#allocation8 + $0x218] ss:$12 sps:$4 sm:$0xff]  }
 0x113   : > { %926 = vmatprep.subr.bf16.mxu0 %v4762_v21  ;;  %1531 = vmatprep.subr.bf16.mxu1 %v4765_v22  ;;  %v4842_v21 = vld [vmem:[#allocation8 + $0x22c] ss:$12 sps:$4 sm:$0xff]   ;;  %v4843_v22 = vld [vmem:[#allocation8 + $0x230] ss:$12 sps:$4 sm:$0xff]  }
 0x116   : > { %927 = vmatpush1.bf16.msra.mxu0 %v4760_v23  ;;  %1532 = vmatpush1.bf16.msra.mxu1 %v4763_v24  ;;  %v4840_v23 = vld [vmem:[#allocation8 + $0x228] ss:$12 sps:$4 sm:$0xff]   ;;  %v4847_v24 = vld [vmem:[#allocation10 + $0x4] ss:$12 sps:$4 sm:$0xff]  }
 0x117   : > { %928 = vmatprep.subr.bf16.mxu0 %v4768_v25  ;;  %1533 = vmatprep.subr.bf16.mxu1 %v4771_v26  ;;  %v4844_v25 = vld [vmem:[#allocation10 + $0xc8] ss:$12 sps:$4 sm:$0xff]   ;;  %v4845_v26 = vld [vmem:[#allocation10] ss:$12 sps:$4 sm:$0xff]  }
 0x11a   : > { %929 = vmatpush1.bf16.msra.mxu0 %v4766_v27  ;;  %1534 = vmatpush1.bf16.msra.mxu1 %v4769_v28  ;;  %v4848_v27 = vld [vmem:[#allocation10 + $0x8] ss:$12 sps:$4 sm:$0xff]  }
 0x11b   : > { %4247 = vmatprep.subr.bf16.mxu0 %v4775_v29  ;;  %1535 = vmatprep.subr.bf16.mxu1 %v4774_v31  ;;  %v4852_v28 = vld [vmem:[#allocation10 + $0x1c] ss:$12 sps:$4 sm:$0xff]   ;;  %v4849_v29 = vld [vmem:[#allocation10 + $0xe0] ss:$12 sps:$4 sm:$0xff]   ;;  %v4850_v31 = vld [vmem:[#allocation10 + $0x18] ss:$12 sps:$4 sm:$0xff]  }
 0x11d   : > { %947 = vmatmul.mubr.bf16.vlgmr.msra.gmra.mrb[0].mxu0 %v5678_v62 }
 0x11e   : > { %4248 = vmatpush3.bf16.msra.mxu0 %v4776_v33  ;;  %1637 = vmatprep.mubr.bf16.mxu0 %v5659_v30  ;;  %v4795_v30 = vld [vmem:[#allocation8 + $0x128] ss:$12 sps:$4 sm:$0xff]  }
 0x11f   : > { %1536 = vmatpush1.bf16.msra.mxu1 %v4772_v32  ;;  %4249 = vmatprep.subr.bf16.mxu0 %v4780_v35  ;;  %v4853_v32 = vld [vmem:[#allocation10 + $0x20] ss:$12 sps:$4 sm:$0xff]   ;;  %v4854_v35 = vld [vmem:[#allocation10 + $0xf8] ss:$12 sps:$4 sm:$0xff]  }
 0x120   : > { %1537 = vmatprep.subr.bf16.mxu1 %v4779_v36  ;;  %v4857_v33 = vld [vmem:[#allocation10 + $0x34] ss:$12 sps:$4 sm:$0xff]   ;;  %v5084_v36 = vld [vmem:[%s5640_s16 + $0x4] ss:$12 sps:$4 sm:$0xff]  }
 0x122   : > { %4250 = vmatpush3.bf16.msra.mxu0 %v4781_v37  ;;  %v4855_v37 = vld [vmem:[#allocation10 + $0x30] ss:$12 sps:$4 sm:$0xff]  }
 0x123   : > { %1538 = vmatpush1.bf16.msra.mxu1 %v4777_v39  ;;  %4251 = vmatprep.subr.bf16.mxu0 %v4785_v40  ;;  %v4858_v39 = vld [vmem:[#allocation10 + $0x38] ss:$12 sps:$4 sm:$0xff]  }
 0x124   : > { %1539 = vmatprep.subr.bf16.mxu1 %v4784_v41  ;;  %v4862_v40 = vld [vmem:[#allocation10 + $0x4c] ss:$12 sps:$4 sm:$0xff]   ;;  %v4859_v41 = vld [vmem:[#allocation10 + $0x110] ss:$12 sps:$4 sm:$0xff]  }
 0x126   : > { %4252 = vmatpush3.bf16.msra.mxu0 %v4786_v43  ;;  %v4864_v43 = vld [vmem:[#allocation10 + $0x128] ss:$12 sps:$4 sm:$0xff]  }
 0x127   : > { %1540 = vmatpush1.bf16.msra.mxu1 %v4782_v42  ;;  %4253 = vmatprep.subr.bf16.mxu0 %v4790_v44  ;;  %v4863_v42 = vld [vmem:[#allocation10 + $0x50] ss:$12 sps:$4 sm:$0xff]  }
 0x128   : > { %1541 = vmatprep.subr.bf16.mxu1 %v4789_v45  ;;  %v4867_v44 = vld [vmem:[#allocation10 + $0x64] ss:$12 sps:$4 sm:$0xff]   ;;  %v4865_v45 = vld [vmem:[#allocation10 + $0x60] ss:$12 sps:$4 sm:$0xff]  }
 0x12a   : > { %4254 = vmatpush3.bf16.msra.mxu0 %v4791_v47  ;;  %v4872_v47 = vld [vmem:[#allocation10 + $0x7c] ss:$12 sps:$4 sm:$0xff]  }
 0x12b   : > { %1542 = vmatpush1.bf16.msra.mxu1 %v4787_v46  ;;  %4255 = vmatprep.subr.bf16.mxu0 %v4795_v30  ;;  %v4868_v46 = vld [vmem:[#allocation10 + $0x68] ss:$12 sps:$4 sm:$0xff]   ;;  %v4869_v30 = vld [vmem:[#allocation10 + $0x140] ss:$12 sps:$4 sm:$0xff]  }
 0x12c   : > { %1543 = vmatprep.subr.bf16.mxu1 %v4794_v48  ;;  %v4870_v48 = vld [vmem:[#allocation10 + $0x78] ss:$12 sps:$4 sm:$0xff]  }
 0x12e   : > { %4256 = vmatpush3.bf16.msra.mxu0 %v4796_v50  ;;  %v4877_v50 = vld [vmem:[#allocation10 + $0x94] ss:$12 sps:$4 sm:$0xff]  }
 0x12f   : > { %1544 = vmatpush1.bf16.msra.mxu1 %v4792_v49  ;;  %4257 = vmatprep.subr.bf16.mxu0 %v4800_v52  ;;  %v4873_v49 = vld [vmem:[#allocation10 + $0x80] ss:$12 sps:$4 sm:$0xff]   ;;  %v4875_v52 = vld [vmem:[#allocation10 + $0x90] ss:$12 sps:$4 sm:$0xff]  }
 0x130   : > { %1545 = vmatprep.subr.bf16.mxu1 %v4799_v51  ;;  %v4874_v51 = vld [vmem:[#allocation10 + $0x158] ss:$12 sps:$4 sm:$0xff]  }
 0x132   : > { %4258 = vmatpush3.bf16.msra.mxu0 %v4801_v53  ;;  %v4878_v53 = vld [vmem:[#allocation10 + $0x98] ss:$12 sps:$4 sm:$0xff]  }
 0x133   : > { %1546 = vmatpush1.bf16.msra.mxu1 %v4797_v54  ;;  %4259 = vmatprep.subr.bf16.mxu0 %v4805_v55  ;;  %v4882_v54 = vld [vmem:[#allocation10 + $0xac] ss:$12 sps:$4 sm:$0xff]   ;;  %v4879_v55 = vld [vmem:[#allocation10 + $0x170] ss:$12 sps:$4 sm:$0xff]  }
 0x134   : > { %1547 = vmatprep.subr.bf16.mxu1 %v4804_v56  ;;  %v4880_v56 = vld [vmem:[#allocation10 + $0xa8] ss:$12 sps:$4 sm:$0xff]  }
 0x136   : > { %4260 = vmatpush3.bf16.msra.mxu0 %v4806_v57  ;;  %v4883_v57 = vld [vmem:[#allocation10 + $0xb0] ss:$12 sps:$4 sm:$0xff]  }
 0x137   : > { %1548 = vmatpush1.bf16.msra.mxu1 %v4802_v58  ;;  %4261 = vmatprep.subr.bf16.mxu0 %v4810_v59  ;;  %v4886_v58 = vld [vmem:[#allocation10 + $0xc4] ss:$12 sps:$4 sm:$0xff]   ;;  %v4884_v59 = vld [vmem:[#allocation10 + $0xc0] ss:$12 sps:$4 sm:$0xff]  }
 0x138   : > { %1549 = vmatprep.subr.bf16.mxu1 %v4809_v60  ;;  %v4887_v60 = vld [vmem:[#allocation10 + $0x188] ss:$12 sps:$4 sm:$0xff]  }
 0x13a   : > { %4262 = vmatpush3.bf16.msra.mxu0 %v4811_v61  ;;  %v4890_v61 = vld [vmem:[#allocation10 + $0xdc] ss:$12 sps:$4 sm:$0xff]  }
 0x13b   : > { %1550 = vmatpush1.bf16.msra.mxu1 %v4807_v63  ;;  %4384 = vmatprep.subr.bf16.mxu0 %v5347_v38  ;;  %v4888_v63 = vld [vmem:[#allocation10 + $0xd8] ss:$12 sps:$4 sm:$0xff]  }
 0x13c   : > { %1562 = vmatprep.subr.bf16.mxu1 %v4814_v0  ;;  %v4891_v0 = vld [vmem:[#allocation10 + $0x1a0] ss:$12 sps:$4 sm:$0xff]  }
 0x13d   : > { %1638 = vmatmul.mubr.bf16.vlgmr.msra.gmra.mrb[4].mxu0 %v5663_v34 }
 0x13e   : > { %1552 = vmatmul.mubr.bf16.vlgmr.msra.gmra.mrb[8].mxu1 %v5663_v34  ;;  %4385 = vmatpush3.bf16.msra.mxu0 %v4815_v1  ;;  %v4827_v34 = vld [vmem:[#allocation8 + $0x1d0] ss:$12 sps:$4 sm:$0xff]   ;;  %v4894_v1 = vld [vmem:[#allocation10 + $0xf4] ss:$12 sps:$4 sm:$0xff]  }
 0x13f   : > { %1563 = vmatpush1.bf16.msra.mxu1 %v4812_v2  ;;  %4386 = vmatprep.subr.bf16.mxu0 %v5347_v38  ;;  %v5085_v2 = vld [vmem:[%s5640_s16] ss:$12 sps:$4 sm:$0xff]  }
 0x140   : > { %1564 = vmatprep.subr.bf16.mxu1 %v4818_v3  ;;  %1594 = vmatprep.mubr.bf16.mxu1 %v5349_v6  ;;  %v4892_v3 = vld [vmem:[#allocation10 + $0xf0] ss:$12 sps:$4 sm:$0xff]  }
 0x141   : > { %4400 = vmatprep.mubr.msk.bf16.mxu0 %vm5348_vm0, %v5347_v38 }
 0x142   : > { %4387 = vmatpush3.bf16.msra.mxu0 %v4819_v4  ;;  %v4895_v4 = vld [vmem:[#allocation10 + $0x1b8] ss:$12 sps:$4 sm:$0xff]  }
 0x143   : > { %1565 = vmatpush1.bf16.msra.mxu1 %v4816_v5  ;;  %4388 = vmatprep.subr.bf16.mxu0 %v5347_v38  ;;  %v4898_v5 = vld [vmem:[#allocation10 + $0x10c] ss:$12 sps:$4 sm:$0xff]  }
 0x144   : > { %1566 = vmatprep.subr.bf16.mxu1 %v4822_v7  ;;  %v4896_v7 = vld [vmem:[#allocation10 + $0x108] ss:$12 sps:$4 sm:$0xff]  }
 0x146   : > { %4389 = vmatpush3.bf16.msra.mxu0 %v4823_v8  ;;  %v4899_v8 = vld [vmem:[#allocation10 + $0x1d0] ss:$12 sps:$4 sm:$0xff]  }
 0x147   : > { %1567 = vmatpush1.bf16.msra.mxu1 %v4820_v9  ;;  %4390 = vmatprep.subr.bf16.mxu0 %v5347_v38  ;;  %v4902_v9 = vld [vmem:[#allocation10 + $0x124] ss:$12 sps:$4 sm:$0xff]  }
 0x148   : > { %1568 = vmatprep.subr.bf16.mxu1 %v4826_v10  ;;  %v4900_v10 = vld [vmem:[#allocation10 + $0x120] ss:$12 sps:$4 sm:$0xff]  }
 0x14a   : > { %4391 = vmatpush3.bf16.msra.mxu0 %v4827_v34  ;;  %v4903_v34 = vld [vmem:[#allocation10 + $0x1e8] ss:$12 sps:$4 sm:$0xff]  }
 0x14b   : > { %1569 = vmatpush1.bf16.msra.mxu1 %v4824_v11  ;;  %4392 = vmatprep.subr.bf16.mxu0 %v5347_v38  ;;  %v4906_v11 = vld [vmem:[#allocation10 + $0x13c] ss:$12 sps:$4 sm:$0xff]  }
 0x14c   : > { %1570 = vmatprep.subr.bf16.mxu1 %v4830_v12  ;;  %v4904_v12 = vld [vmem:[#allocation10 + $0x138] ss:$12 sps:$4 sm:$0xff]  }
 0x14e   : > { %4393 = vmatpush3.bf16.msra.mxu0 %v4831_v13  ;;  %v4907_v13 = vld [vmem:[#allocation10 + $0x200] ss:$12 sps:$4 sm:$0xff]  }
 0x14f   : > { %1571 = vmatpush1.bf16.msra.mxu1 %v4828_v14  ;;  %4394 = vmatprep.subr.bf16.mxu0 %v5347_v38  ;;  %v4910_v14 = vld [vmem:[#allocation10 + $0x154] ss:$12 sps:$4 sm:$0xff]  }
 0x150   : > { %1572 = vmatprep.subr.bf16.mxu1 %v4834_v15  ;;  %v4908_v15 = vld [vmem:[#allocation10 + $0x150] ss:$12 sps:$4 sm:$0xff]  }
 0x152   : > { %4395 = vmatpush3.bf16.msra.mxu0 %v4835_v16  ;;  %v4911_v16 = vld [vmem:[#allocation10 + $0x218] ss:$12 sps:$4 sm:$0xff]  }
 0x153   : > { %1573 = vmatpush1.bf16.msra.mxu1 %v4832_v17  ;;  %4396 = vmatprep.subr.bf16.mxu0 %v5347_v38  ;;  %v4914_v17 = vld [vmem:[#allocation10 + $0x16c] ss:$12 sps:$4 sm:$0xff]  }
 0x154   : > { %1574 = vmatprep.subr.bf16.mxu1 %v4838_v18  ;;  %v4912_v18 = vld [vmem:[#allocation10 + $0x168] ss:$12 sps:$4 sm:$0xff]  }
 0x156   : > { %4397 = vmatpush3.bf16.msra.mxu0 %v4839_v20  ;;  %v4918_v20 = vld [vmem:[#allocation10 + $0x184] ss:$12 sps:$4 sm:$0xff]  }
 0x157   : > { %1575 = vmatpush1.bf16.msra.mxu1 %v4836_v19  ;;  %4398 = vmatprep.subr.bf16.mxu0 %v5347_v38  ;;  %v4915_v19 = vld [vmem:[#allocation10 + $0x230] ss:$12 sps:$4 sm:$0xff]  }
 0x158   : > { %1576 = vmatprep.subr.bf16.mxu1 %v4842_v21  ;;  %v4916_v21 = vld [vmem:[#allocation10 + $0x180] ss:$12 sps:$4 sm:$0xff]  }
 0x15a   : > { %4399 = vmatpush3.bf16.msra.mxu0 %v4843_v22  ;;  %v4921_v22 = vld [vmem:[#allocation10 + $0x19c] ss:$12 sps:$4 sm:$0xff]  }
 0x15b   : > { %1577 = vmatpush1.bf16.msra.mxu1 %v4840_v23  ;;  %2167 = vmatprep.subr.bf16.mxu0 %v4847_v24  ;;  %v5086_v23 = vld [vmem:[%s5640_s16 + $0x8] ss:$12 sps:$4 sm:$0xff]   ;;  %v4919_v24 = vld [vmem:[#allocation10 + $0x198] ss:$12 sps:$4 sm:$0xff]   ;;  %s5263_s16 = scalar_lea.vmem %s5262_s10, 1536 }
 0x15c   : > { %4278 = vmatprep.subr.bf16.mxu1 %v4844_v25  ;;  %v4924_v25 = vld [vmem:[#allocation10 + $0x1b4] ss:$12 sps:$4 sm:$0xff]   ;;  %p5265_p12 = scmp.lt.s32.totalorder %s5263_s16, %s5257_s23 }
 0x15d   : > { %4401 = vmatmul.mubr.bf16.vlgmr.msra.gmra.mrb[8].mxu0 %v5678_v62 }
 0x15e   : > { %1595 = vmatmul.mubr.bf16.vlgmr.msra.gmra.mrb[8].mxu1 %v5678_v62  ;;  %2168 = vmatpush1.bf16.msra.mxu0 %v4845_v26  ;;  %v4860_v62 = vld [vmem:[#allocation10 + $0x48] ss:$12 sps:$4 sm:$0xff]   ;;  %v4922_v26 = vld [vmem:[#allocation10 + $0x1b0] ss:$12 sps:$4 sm:$0xff]   ;;  %p5266_p13 = por %p5265_p12, %p5264_p11 }
 0x15f   : > { %4279 = vmatpush3.bf16.msra.mxu1 %v4848_v27  ;;  %2169 = vmatprep.subr.bf16.mxu0 %v4852_v28  ;;  %v4927_v27 = vld [vmem:[#allocation10 + $0x1cc] ss:$12 sps:$4 sm:$0xff]   ;;  %v4925_v28 = vld [vmem:[#allocation10 + $0x1c8] ss:$12 sps:$4 sm:$0xff]  }
 0x160   : > { %4280 = vmatprep.subr.bf16.mxu1 %v4849_v29  ;;  %2285 = vmatprep.mubr.bf16.mxu1 %v5084_v36  ;;  %v4930_v29 = vld [vmem:[#allocation10 + $0x1e4] ss:$12 sps:$4 sm:$0xff]   ;;  %p5267_p8 = pnand %p5266_p13, %p5260_p1 }
 0x161   : > { %2199 = vmatprep.mubr.bf16.mxu0 %v5084_v36 }
 0x162   : > { %2170 = vmatpush1.bf16.msra.mxu0 %v4850_v31  ;;  %v4928_v31 = vld [vmem:[#allocation10 + $0x1e0] ss:$12 sps:$4 sm:$0xff]  }
 0x163   : > { %4281 = vmatpush3.bf16.msra.mxu1 %v4853_v32  ;;  %2171 = vmatprep.subr.bf16.mxu0 %v4857_v33  ;;  %v4933_v32 = vld [vmem:[#allocation10 + $0x1fc] ss:$12 sps:$4 sm:$0xff]   ;;  %v4931_v33 = vld [vmem:[#allocation10 + $0x1f8] ss:$12 sps:$4 sm:$0xff]  }
 0x164   : > { %4282 = vmatprep.subr.bf16.mxu1 %v4854_v35  ;;  %v4936_v35 = vld [vmem:[#allocation10 + $0x214] ss:$12 sps:$4 sm:$0xff]  }
 0x166   : > { %2172 = vmatpush1.bf16.msra.mxu0 %v4855_v37 }
 0x167   : > { %4283 = vmatpush3.bf16.msra.mxu1 %v4858_v39  ;;  %2173 = vmatprep.subr.bf16.mxu0 %v4862_v40  ;;  %v4934_v39 = vld [vmem:[#allocation10 + $0x210] ss:$12 sps:$4 sm:$0xff]  }
 0x168   : > { %4284 = vmatprep.subr.bf16.mxu1 %v4859_v41 }
 0x16a   : > { %2174 = vmatpush1.bf16.msra.mxu0 %v4860_v62  ;;  %v4939_v62 = vld [vmem:[#allocation10 + $0x22c] ss:$12 sps:$4 sm:$0xff]  }
 0x16b   : > { %4285 = vmatpush3.bf16.msra.mxu1 %v4863_v42  ;;  %2175 = vmatprep.subr.bf16.mxu0 %v4867_v44  ;;  %v4937_v44 = vld [vmem:[#allocation10 + $0x228] ss:$12 sps:$4 sm:$0xff]  }
 0x16c   : > { %4286 = vmatprep.subr.bf16.mxu1 %v4864_v43 }
 0x16e   : > { %2176 = vmatpush1.bf16.msra.mxu0 %v4865_v45 }
 0x16f   : > { %4287 = vmatpush3.bf16.msra.mxu1 %v4868_v46  ;;  %2177 = vmatprep.subr.bf16.mxu0 %v4872_v47 }
 0x170   : > { %4288 = vmatprep.subr.bf16.mxu1 %v4869_v30 }
 0x172   : > { %2178 = vmatpush1.bf16.msra.mxu0 %v4870_v48 }
 0x173   : > { %4289 = vmatpush3.bf16.msra.mxu1 %v4873_v49  ;;  %2179 = vmatprep.subr.bf16.mxu0 %v4877_v50 }
 0x174   : > { %4290 = vmatprep.subr.bf16.mxu1 %v4874_v51 }
 0x176   : > { %2180 = vmatpush1.bf16.msra.mxu0 %v4875_v52 }
 0x177   : > { %4291 = vmatpush3.bf16.msra.mxu1 %v4878_v53  ;;  %2181 = vmatprep.subr.bf16.mxu0 %v4882_v54 }
 0x178   : > { %4292 = vmatprep.subr.bf16.mxu1 %v4879_v55 }
 0x17a   : > { %2182 = vmatpush1.bf16.msra.mxu0 %v4880_v56 }
 0x17b   : > { %4293 = vmatpush3.bf16.msra.mxu1 %v4883_v57  ;;  %2183 = vmatprep.subr.bf16.mxu0 %v4886_v58 }
 0x17c   : > { %4404 = vmatprep.subr.bf16.mxu1 %v5347_v38 }
 0x17e   : > { %2286 = vmatmul.mubr.bf16.vlgmr.msra.gmra.mrb[12].mxu1 %v5085_v2  ;;  %2184 = vmatpush1.bf16.msra.mxu0 %v4884_v59 }
 0x17f   : > { %4405 = vmatpush3.bf16.msra.mxu1 %v4887_v60  ;;  %2185 = vmatprep.subr.bf16.mxu0 %v4890_v61 }
 0x180   : > { %4406 = vmatprep.subr.bf16.mxu1 %v5347_v38  ;;  %4420 = vmatprep.mubr.msk.bf16.mxu1 %vm5348_vm0, %v5347_v38 }
 0x182   : > { %2186 = vmatpush1.bf16.msra.mxu0 %v4888_v63 }
 0x183   : > { %4407 = vmatpush3.bf16.msra.mxu1 %v4891_v0  ;;  %2187 = vmatprep.subr.bf16.mxu0 %v4894_v1 }
 0x184   : > { %4408 = vmatprep.subr.bf16.mxu1 %v5347_v38 }
 0x186   : > { %2188 = vmatpush1.bf16.msra.mxu0 %v4892_v3 }
 0x187   : > { %4409 = vmatpush3.bf16.msra.mxu1 %v4895_v4  ;;  %2189 = vmatprep.subr.bf16.mxu0 %v4898_v5 }
 0x188   : > { %4410 = vmatprep.subr.bf16.mxu1 %v5347_v38 }
 0x18a   : > { %2190 = vmatpush1.bf16.msra.mxu0 %v4896_v7 }
 0x18b   : > { %4411 = vmatpush3.bf16.msra.mxu1 %v4899_v8  ;;  %2191 = vmatprep.subr.bf16.mxu0 %v4902_v9 }
 0x18c   : > { %4412 = vmatprep.subr.bf16.mxu1 %v5347_v38 }
 0x18e   : > { %2192 = vmatpush1.bf16.msra.mxu0 %v4900_v10 }
 0x18f   : > { %4413 = vmatpush3.bf16.msra.mxu1 %v4903_v34  ;;  %2193 = vmatprep.subr.bf16.mxu0 %v4906_v11 }
 0x190   : > { %4414 = vmatprep.subr.bf16.mxu1 %v5347_v38 }
 0x192   : > { %2194 = vmatpush1.bf16.msra.mxu0 %v4904_v12 }
 0x193   : > { %4415 = vmatpush3.bf16.msra.mxu1 %v4907_v13  ;;  %2195 = vmatprep.subr.bf16.mxu0 %v4910_v14 }
 0x194   : > { %4416 = vmatprep.subr.bf16.mxu1 %v5347_v38 }
 0x196   : > { %2196 = vmatpush1.bf16.msra.mxu0 %v4908_v15 }
 0x197   : > { %4417 = vmatpush3.bf16.msra.mxu1 %v4911_v16  ;;  %2197 = vmatprep.subr.bf16.mxu0 %v4914_v17 }
 0x198   : > { %4418 = vmatprep.subr.bf16.mxu1 %v5347_v38 }
 0x19a   : > { %2198 = vmatpush1.bf16.msra.mxu0 %v4912_v18 }
 0x19b   : > { %4419 = vmatpush3.bf16.msra.mxu1 %v4915_v19  ;;  %2210 = vmatprep.subr.bf16.mxu0 %v4918_v20 }
 0x19c   : > { %4424 = vmatprep.subr.bf16.mxu1 %v5347_v38 }
 0x19d   : > { %2200 = vmatmul.mubr.bf16.vlgmr.msra.gmra.mrb[12].mxu0 %v5085_v2 }
 0x19e   : > { %4421 = vmatmul.mubr.bf16.vlgmr.msra.gmra.mrb[16].mxu1 %v5086_v23  ;;  %2211 = vmatpush1.bf16.msra.mxu0 %v4916_v21 }
 0x19f   : > { %2212 = vmatprep.subr.bf16.mxu0 %v4921_v22  ;;  %2242 = vmatprep.mubr.bf16.mxu0 %v5349_v6 }
 0x1a0   : > { %4426 = vmatprep.mubr.msk.bf16.mxu1 %vm5348_vm0, %v5347_v38 }
 0x1a2   : > { %2213 = vmatpush1.bf16.msra.mxu0 %v4919_v24 }
 0x1a3   : > { %2214 = vmatprep.subr.bf16.mxu0 %v4924_v25 }
 0x1a6   : > { %2215 = vmatpush1.bf16.msra.mxu0 %v4922_v26 }
 0x1a7   : > { %2216 = vmatprep.subr.bf16.mxu0 %v4927_v27 }
 0x1aa   : > { %2217 = vmatpush1.bf16.msra.mxu0 %v4925_v28 }
 0x1ab   : > { %2218 = vmatprep.subr.bf16.mxu0 %v4930_v29 }
 0x1ae   : > { %2219 = vmatpush1.bf16.msra.mxu0 %v4928_v31 }
 0x1af   : > { %2220 = vmatprep.subr.bf16.mxu0 %v4933_v32 }
 0x1b0   : > { %v4232_v36 = vpop.f32.mrb[0].mxu1 }
 0x1b1   : > { %v4233_v37 = vpop.f32.mrb[1].mxu1 }
 0x1b2   : > { %2221 = vmatpush1.bf16.msra.mxu0 %v4931_v33  ;;  %v4234_v40 = vadd.f32 %v4233_v37, %v4232_v36  ;;  %v4235_v41 = vpop.f32.mrb[2].mxu1  ;;  %v5752_v36 = vld [vmem:[#allocation5] sm:$0xff] }
 0x1b3   : > { %2222 = vmatprep.subr.bf16.mxu0 %v4936_v35  ;;  %v4236_v42 = vpop.f32.mrb[3].mxu1 }
 0x1b4   : > { %v4237_v43 = vadd.f32 %v4236_v42, %v4235_v41 }
 0x1b6   : > { %2223 = vmatpush1.bf16.msra.mxu0 %v4934_v39  ;;  %v5754_v39 = vld [vmem:[#allocation5 + $0x8] sm:$0xff] }
 0x1b7   : > { %2224 = vmatprep.subr.bf16.mxu0 %v4939_v62 }
 0x1ba   : > { %2225 = vmatpush1.bf16.msra.mxu0 %v4937_v44 }
 0x1bb   : > { %4472 = vmatprep.subr.bf16.mxu0 %v5347_v38 }
 0x1bd   : > { %2243 = vmatmul.mubr.bf16.vlgmr.msra.gmra.mrb[12].mxu0 %v5086_v23 }
 0x1be   : > { %4474 = vmatprep.mubr.msk.bf16.mxu0 %vm5348_vm0, %v5347_v38 }
 0x1d0   : > { %v1032_v45 = vpop.f32.mrb[4].mxu1 }
 0x1d1   : > { %v1033_v46 = vadd.f32 %v4234_v40, %v1032_v45  ;;  %v4382_v47 = vpop.f32.mrb[5].mxu1 }
 0x1d2   : > { %v1035_v30 = vpop.f32.mrb[6].mxu1 }
 0x1d3   : > { %v1036_v48 = vadd.f32 %v4237_v43, %v1035_v30  ;;  %v4383_v49 = vpop.f32.mrb[7].mxu1 }
 0x1d5   : > { %v5721_v50 = vpack.c.bf16 %v1036_v48, %v1033_v46 }
 0x1f0   : > { %v948_v51 = vpop.f32.mrb[0].mxu0 }
 0x1f1   : > { %v950_v52 = vpop.f32.mrb[1].mxu0 }
 0x1f2   : > { %v952_v53 = vpop.f32.mrb[2].mxu0 }
 0x1f3   : > { %v5723_v54 = vpack.c.bf16 %v952_v53, %v948_v51  ;;  %v954_v55 = vpop.f32.mrb[3].mxu0 }
 0x1f4   : > { %v5725_v56 = vpack.c.bf16 %v954_v55, %v950_v52 }
 0x210   : > { %v4263_v57 = vpop.f32.mrb[4].mxu0 }
 0x211   : > { %v4264_v58 = vpop.f32.mrb[5].mxu0 }
 0x212   : > { %v4265_v59 = vadd.f32 %v4264_v58, %v4263_v57  ;;  %v4266_v60 = vpop.f32.mrb[6].mxu0 }
 0x213   : > { %v4267_v61 = vpop.f32.mrb[7].mxu0 }
 0x214   : > { %v4268_v63 = vadd.f32 %v4267_v61, %v4266_v60 }
 0x230   : > { %v1680_v0 = vpop.f32.mrb[8].mxu0 }
 0x231   : > { %v1596_v1 = vpop.f32.mrb[8].mxu1  ;;  %v1681_v2 = vadd.f32 %v4265_v59, %v1680_v0  ;;  %v4402_v3 = vpop.f32.mrb[9].mxu0 }
 0x232   : > { %v1598_v4 = vpop.f32.mrb[9].mxu1  ;;  %v1683_v5 = vpop.f32.mrb[10].mxu0 }
 0x233   : > { %v1600_v7 = vpop.f32.mrb[10].mxu1  ;;  %v1684_v8 = vadd.f32 %v4268_v63, %v1683_v5  ;;  %v4403_v9 = vpop.f32.mrb[11].mxu0 }
 0x234   : > { %v2338_v10 = vpack.c.bf16 %v1600_v7, %v1596_v1  ;;  %v1602_v34 = vpop.f32.mrb[11].mxu1 }
 0x235   : > { %v5727_v11 = vpack.c.bf16 %v1684_v8, %v1681_v2  ;;  %v5729_v12 = vpack.c.bf16 %v1602_v34, %v1598_v4 }
 0x236   : > { %v2351_v13 = vsel %vm2346_vm1, %v2338_v10, 0 }
 0x237   : > { %4425 = vmatpush3.bf16.xpose.msra.mxu1 %v2351_v13  ;;  %v2832_v14 = vsel %vm2346_vm1, %v5727_v11, 0 }
 0x238   : > { %4473 = vmatpush3.bf16.xpose.msra.mxu0 %v2832_v14  ;;  %4430 = vmatprep.subr.bf16.mxu1 %v5347_v38 }
 0x239   : > { %4484 = vmatprep.subr.bf16.mxu0 %v5347_v38 }
 0x23e   : > { %4427 = vmatmul.mubr.msk.bf16.vlgmr.msra.gmra.mrb[20].mxu1 %vm2346_vm1, %v5723_v54 }
 0x23f   : > { %4475 = vmatmul.mubr.msk.bf16.vlgmr.msra.gmra.mrb[16].mxu0 %vm2346_vm1, %v5721_v50  ;;  %4432 = vmatprep.mubr.msk.bf16.mxu1 %vm5348_vm0, %v5347_v38 }
 0x240   : > { %4486 = vmatprep.mubr.msk.bf16.mxu0 %vm5348_vm0, %v5347_v38 }
 0x251   : > { %v4294_v15 = vpop.f32.mrb[12].mxu1 }
 0x252   : > { %v4295_v16 = vpop.f32.mrb[13].mxu1 }
 0x253   : > { %v4296_v17 = vadd.f32 %v4295_v16, %v4294_v15  ;;  %v4297_v18 = vpop.f32.mrb[14].mxu1 }
 0x254   : > { %v4298_v19 = vpop.f32.mrb[15].mxu1 }
 0x255   : > { %v4299_v20 = vadd.f32 %v4298_v19, %v4297_v18 }
 0x271   : > { %v2328_v21 = vpop.f32.mrb[16].mxu1 }
 0x272   : > { %v2329_v22 = vadd.f32 %v4296_v17, %v2328_v21  ;;  %v4422_v23 = vpop.f32.mrb[17].mxu1 }
 0x273   : > { %v2331_v24 = vpop.f32.mrb[18].mxu1 }
 0x274   : > { %v2332_v25 = vadd.f32 %v4299_v20, %v2331_v24  ;;  %v4423_v26 = vpop.f32.mrb[19].mxu1 }
 0x276   : > { %v5744_v27 = vpack.c.bf16 %v2332_v25, %v2329_v22 }
 0x290   : > { %v2244_v28 = vpop.f32.mrb[12].mxu0 }
 0x291   : > { %v2246_v29 = vpop.f32.mrb[13].mxu0 }
 0x292   : > { %v2248_v31 = vpop.f32.mrb[14].mxu0 }
 0x293   : > { %v5746_v32 = vpack.c.bf16 %v2248_v31, %v2244_v28  ;;  %v2250_v33 = vpop.f32.mrb[15].mxu0 }
 0x294   : > { %v5748_v35 = vpack.c.bf16 %v2250_v33, %v2246_v29 }
 0x295   : > { %4431 = vmatpush3.bf16.msra.mxu1 %v5746_v32 }
 0x296   : > { %4436 = vmatprep.subr.bf16.mxu1 %v5347_v38 }
 0x311   : > { %v2387_v37 = vpop.f32.mrb[20].mxu1 }
 0x312   : > { %v2388_v40 = vadd.f32 %v2387_v37, %v5752_v36  ;;  %v4428_v41 = vpop.f32.mrb[21].mxu1  ;;  %v5757_v62 = vpop.f32.mrb[16].mxu0 }
 0x313   : > { %v2390_v42 = vpop.f32.mrb[22].mxu1  ;;  %v4476_v43 = vpop.f32.mrb[17].mxu0 }
 0x314   : > { %v2391_v44 = vadd.f32 %v2390_v42, %v5754_v39  ;;  %v4429_v45 = vpop.f32.mrb[23].mxu1  ;;  %v2395_v46 = vsel %vm2394_vm2, %v2388_v40, -inf  ;;  %v5761_v47 = vpop.f32.mrb[18].mxu0 }
 0x315   : > { %2396 = vmax.xlane.f32.xlu0 %v2395_v46  ;;  %v4477_v30 = vpop.f32.mrb[19].mxu0 }
 0x316   : > { %v2398_v48 = vsel %vm2394_vm2, %v2391_v44, -inf }
 0x319   : > { %2399 = vmax.xlane.f32.xlu0 %v2398_v48 }
 0x32f   : > { %2467 = vrot.lane.b32.xlu0 %v2338_v10, %s5350_s8 }
 0x3a2   : > { %v2397_v49 = vpop.xlane.xlu0 %2396 }
 0x3a3   : > { %v2401_v51 = vsub.f32 %v2388_v40, %v2397_v49 }
 0x3a5   : > { %v2403_v52 = vmul.f32 1.442695, %v2401_v51 }
 0x3a6   : > { %v2400_v53 = vpop.xlane.xlu0 %2399 }
 0x3a7   : > { %5036 = vpow2.f32 %v2403_v52  ;;  %v2402_v55 = vsub.f32 %v2391_v44, %v2400_v53 }
 0x3a9   : > { %v2405_v57 = vmul.f32 1.442695, %v2402_v55 }
 0x3aa   : > { %v2468_v5 = vpop.permute.xlu0 %2467 }
 0x3ab   : > { %5038 = vpow2.f32 %v2405_v57  ;;  %v2473_v8 = vsel %vm2346_vm1, %v2468_v5, 0 }
 0x3b1   : > { %v5037_v58 = vpop.eup %5036 }
 0x3b2   : > { %v2407_v59 = vsel %vm2394_vm2, %v5037_v58, 0.0 }
 0x3b3   : > { %2408 = vadd.xlane.f32.xlu1 %v2407_v59 }
 0x3b5   : > { %v5039_v60 = vpop.eup %5038 }
 0x3b6   : > { %v2410_v61 = vsel %vm2394_vm2, %v5039_v60, 0.0 }
 0x3b7   : > { %2411 = vadd.xlane.f32.xlu1 %v2410_v61 }
 0x3c8   : > { %2464 = vrot.lane.b32.xlu1 %v5723_v54, %s5350_s8 }
 0x440   : > { %v2409_v63 = vpop.xlane.xlu1 %2408 }
 0x441   : > { %5040 = vrcp.f32 %v2409_v63 }
 0x444   : > { %v2412_v0 = vpop.xlane.xlu1 %2411 }
 0x445   : > { %5042 = vrcp.f32 %v2412_v0 }
 0x448   : > { %v2465_v54 = vpop.permute.xlu1 %2464 }
 0x44b   : > { %v5041_v1 = vpop.eup %5040 }
 0x44c   : > { %v2415_v3 = vmul.f32 %v5041_v1, %v5037_v58 }
 0x44f   : > { %v5043_v2 = vpop.eup %5042 }
 0x450   : > { %v2416_v4 = vmul.f32 %v5043_v2, %v5039_v60 }
 0x452   : > { %v2417_v7 = vpack.c.bf16 %v2416_v4, %v2415_v3 }
 0x454   : > { %4433 = vmatmul.mubr.msk.bf16.vlgmr.msra.gmra.mrb[24].mxu1 %vm2394_vm2, %v2417_v7 }
 0x455   : > { %4437 = vmatpush3.bf16.xpose.msra.mxu1 %v2473_v8  ;;  %4438 = vmatprep.mubr.msk.bf16.mxu1 %vm5348_vm0, %v5347_v38 }
 0x456   : > { %4442 = vmatprep.subr.bf16.mxu1 %v5347_v38 }
 0x45c   : > { %4439 = vmatmul.mubr.msk.bf16.vlgmr.msra.gmra.mrb[28].mxu1 %vm2346_vm1, %v2465_v54 }
 0x45d   : > { %4444 = vmatprep.mubr.msk.bf16.mxu1 %vm5348_vm0, %v5347_v38 }
 0x527   : > { %v5777_v9 = vpop.f32.mrb[24].mxu1 }
 0x528   : > { %v4434_v10 = vpop.f32.mrb[25].mxu1 }
 0x529   : > { %v5779_v34 = vpop.f32.mrb[26].mxu1 }
 0x52a   : > { %v2462_v13 = vpack.c.bf16 %v5779_v34, %v5777_v9  ;;  %v4435_v14 = vpop.f32.mrb[27].mxu1  ;;  %v5012_v9 = vld [vmem:[#allocation11 + $0x1b0] ss:$12 sps:$4 sm:$0xff]   ;;  %v5015_v34 = vld [vmem:[#allocation11 + $0x1b8] ss:$12 sps:$4 sm:$0xff]  }
 0x52f   : > { %v2509_v15 = vpop.f32.mrb[28].mxu1 }
 0x530   : > { %v2510_v16 = vadd.f32 %v2509_v15, %v5752_v36  ;;  %v4440_v17 = vpop.f32.mrb[29].mxu1 }
 0x531   : > { %v2512_v18 = vpop.f32.mrb[30].mxu1 }
 0x532   : > { %v2513_v19 = vadd.f32 %v2512_v18, %v5754_v39  ;;  %v4441_v20 = vpop.f32.mrb[31].mxu1  ;;  %v2516_v21 = vsel %vm2394_vm2, %v2510_v16, -inf }
 0x533   : > { %2517 = vmax.xlane.f32.xlu1 %v2516_v21 }
 0x534   : > { %v2519_v22 = vsel %vm2394_vm2, %v2513_v19, -inf }
 0x535   : > { %2520 = vmax.xlane.f32.xlu0 %v2519_v22 }
 0x5c0   : > { %v2518_v23 = vpop.xlane.xlu1 %2517 }
 0x5c1   : > { %v2522_v24 = vsub.f32 %v2510_v16, %v2518_v23 }
 0x5c2   : > { %v2521_v25 = vpop.xlane.xlu0 %2520 }
 0x5c3   : > { %v2524_v26 = vmul.f32 1.442695, %v2522_v24  ;;  %v2523_v28 = vsub.f32 %v2513_v19, %v2521_v25 }
 0x5c5   : > { %5044 = vpow2.f32 %v2524_v26  ;;  %v2526_v29 = vmul.f32 1.442695, %v2523_v28 }
 0x5c7   : > { %5046 = vpow2.f32 %v2526_v29 }
 0x5cf   : > { %v5045_v31 = vpop.eup %5044 }
 0x5d0   : > { %v2528_v33 = vsel %vm2394_vm2, %v5045_v31, 0.0 }
 0x5d1   : > { %v5047_v37 = vpop.eup %5046  ;;  %2529 = vadd.xlane.f32.xlu0 %v2528_v33 }
 0x5d2   : > { %v2531_v40 = vsel %vm2394_vm2, %v5047_v37, 0.0 }
 0x5d3   : > { %2532 = vadd.xlane.f32.xlu1 %v2531_v40 }
 0x5e7   : > { %2540 = vrot.lane.b32.xlu0 %v5746_v32, %s5350_s8 }
 0x5eb   : > { %2704 = vrot.lane.b32.xlu0 %v5725_v56, %s5350_s8 }
 0x5ef   : > { %2947 = vrot.lane.b32.xlu0 %v5727_v11, %s5350_s8 }
 0x5f3   : > { %2944 = vrot.lane.b32.xlu0 %v5721_v50, %s5350_s8  ;;  %v2592_v50 = vsel %vm2346_vm1, %v5729_v12, 0 }
 0x65e   : > { %v2530_v41 = vpop.xlane.xlu0 %2529 }
 0x65f   : > { %5048 = vrcp.f32 %v2530_v41 }
 0x660   : > { %v2533_v42 = vpop.xlane.xlu1 %2532 }
 0x661   : > { %5050 = vrcp.f32 %v2533_v42 }
 0x662   : > { %v2541_v43 = vpop.permute.xlu0 %2540 }
 0x663   : > { %4443 = vmatpush3.bf16.msra.mxu1 %v2541_v43 }
 0x664   : > { %4448 = vmatprep.subr.bf16.mxu1 %v5347_v38 }
 0x666   : > { %v5798_v44 = vpop.permute.xlu0 %2704 }
 0x669   : > { %v5049_v32 = vpop.eup %5048 }
 0x66a   : > { %v2948_v45 = vpop.permute.xlu0 %2947  ;;  %v2536_v48 = vmul.f32 %v5049_v32, %v5045_v31 }
 0x66b   : > { %v5051_v46 = vpop.eup %5050  ;;  %v2953_v30 = vsel %vm2346_vm1, %v2948_v45, 0 }
 0x66c   : > { %v2537_v11 = vmul.f32 %v5051_v46, %v5047_v37  ;;  %4485 = vmatpush3.bf16.xpose.msra.mxu0 %v2953_v30 }
 0x66e   : > { %v2538_v49 = vpack.c.bf16 %v2537_v11, %v2536_v48  ;;  %v2945_v51 = vpop.permute.xlu0 %2944  ;;  %v2869_v11 = vadd.f32 %v5757_v62, %v5752_v36 }
 0x670   : > { %4445 = vmatmul.mubr.msk.bf16.vlgmr.msra.gmra.mrb[32].mxu1 %vm2394_vm2, %v2538_v49 }
 0x671   : > { %4449 = vmatpush3.bf16.xpose.msra.mxu1 %v2592_v50  ;;  %4450 = vmatprep.mubr.msk.bf16.mxu1 %vm5348_vm0, %v5347_v38 }
 0x672   : > { %4454 = vmatprep.subr.bf16.mxu1 %v5347_v38 }
 0x673   : > { %4487 = vmatmul.mubr.msk.bf16.vlgmr.msra.gmra.mrb[20].mxu0 %vm2346_vm1, %v2945_v51  ;;  %v2872_v51 = vadd.f32 %v5761_v47, %v5754_v39 }
 0x678   : > { %4451 = vmatmul.mubr.msk.bf16.vlgmr.msra.gmra.mrb[36].mxu1 %vm2346_vm1, %v5725_v56 }
 0x679   : > { %4455 = vmatpush3.bf16.msra.mxu1 %v5748_v35  ;;  %4456 = vmatprep.mubr.msk.bf16.mxu1 %vm5348_vm0, %v5347_v38 }
 0x67a   : > { %4460 = vmatprep.subr.bf16.mxu1 %v5347_v38 }
 0x743   : > { %v5814_v52 = vpop.f32.mrb[32].mxu1 }
 0x744   : > { %v4446_v53 = vpop.f32.mrb[33].mxu1 }
 0x745   : > { %v5816_v55 = vpop.f32.mrb[34].mxu1  ;;  %v2875_v53 = vsel %vm2394_vm2, %v2869_v11, -inf }
 0x746   : > { %v2587_v57 = vpack.c.bf16 %v5816_v55, %v5814_v52  ;;  %v4447_v58 = vpop.f32.mrb[35].mxu1  ;;  %v2989_v59 = vpop.f32.mrb[20].mxu0  ;;  %v5004_v55 = vld [vmem:[#allocation11 + $0x180] ss:$12 sps:$4 sm:$0xff]  }
 0x747   : > { %v4488_v60 = vpop.f32.mrb[21].mxu0  ;;  %v2990_v46 = vadd.f32 %v2989_v59, %v5752_v36  ;;  %v2878_v59 = vsel %vm2394_vm2, %v2872_v51, -inf }
 0x748   : > { %v5820_v61 = vpop.f32.mrb[22].mxu0 }
 0x749   : > { %v4489_v56 = vpop.f32.mrb[23].mxu0  ;;  %v2996_v50 = vsel %vm2394_vm2, %v2990_v46, -inf  ;;  %v2993_v58 = vadd.f32 %v5820_v61, %v5754_v39 }
 0x74b   : > { %v2628_v63 = vpop.f32.mrb[36].mxu1 }
 0x74c   : > { %v2629_v0 = vadd.f32 %v2628_v63, %v5752_v36  ;;  %v4452_v1 = vpop.f32.mrb[37].mxu1 }
 0x74d   : > { %v2631_v2 = vpop.f32.mrb[38].mxu1 }
 0x74e   : > { %v2632_v3 = vadd.f32 %v2631_v2, %v5754_v39  ;;  %v4453_v4 = vpop.f32.mrb[39].mxu1  ;;  %v2635_v5 = vsel %vm2394_vm2, %v2629_v0, -inf }
 0x74f   : > { %2636 = vmax.xlane.f32.xlu1 %v2635_v5 }
 0x750   : > { %v2638_v7 = vsel %vm2394_vm2, %v2632_v3, -inf }
 0x753   : > { %2639 = vmax.xlane.f32.xlu1 %v2638_v7 }
 0x7dc   : > { %v2637_v8 = vpop.xlane.xlu1 %2636 }
 0x7dd   : > { %v2641_v54 = vsub.f32 %v2629_v0, %v2637_v8 }
 0x7df   : > { %v2643_v10 = vmul.f32 1.442695, %v2641_v54 }
 0x7e0   : > { %v2640_v14 = vpop.xlane.xlu1 %2639 }
 0x7e1   : > { %5052 = vpow2.f32 %v2643_v10  ;;  %v2642_v15 = vsub.f32 %v2632_v3, %v2640_v14 }
 0x7e3   : > { %v2645_v16 = vmul.f32 1.442695, %v2642_v15 }
 0x7e5   : > { %5054 = vpow2.f32 %v2645_v16 }
 0x7eb   : > { %v5053_v17 = vpop.eup %5052 }
 0x7ec   : > { %v2647_v18 = vsel %vm2394_vm2, %v5053_v17, 0.0 }
 0x7ed   : > { %2648 = vadd.xlane.f32.xlu1 %v2647_v18 }
 0x7ef   : > { %v5055_v19 = vpop.eup %5054 }
 0x7f0   : > { %v2650_v20 = vsel %vm2394_vm2, %v5055_v19, 0.0 }
 0x7f1   : > { %2651 = vadd.xlane.f32.xlu1 %v2650_v20 }
 0x802   : > { %2707 = vrot.lane.b32.xlu1 %v5729_v12, %s5350_s8 }
 0x87a   : > { %v2649_v21 = vpop.xlane.xlu1 %2648 }
 0x87b   : > { %5056 = vrcp.f32 %v2649_v21 }
 0x87e   : > { %v2652_v22 = vpop.xlane.xlu1 %2651 }
 0x87f   : > { %5058 = vrcp.f32 %v2652_v22 }
 0x882   : > { %v2708_v28 = vpop.permute.xlu1 %2707 }
 0x883   : > { %v2713_v31 = vsel %vm2346_vm1, %v2708_v28, 0 }
 0x885   : > { %v5057_v23 = vpop.eup %5056 }
 0x886   : > { %v2655_v25 = vmul.f32 %v5057_v23, %v5053_v17 }
 0x889   : > { %v5059_v24 = vpop.eup %5058 }
 0x88a   : > { %v2656_v26 = vmul.f32 %v5059_v24, %v5055_v19 }
 0x88c   : > { %v2657_v29 = vpack.c.bf16 %v2656_v26, %v2655_v25 }
 0x88e   : > { %4457 = vmatmul.mubr.msk.bf16.vlgmr.msra.gmra.mrb[40].mxu1 %vm2394_vm2, %v2657_v29 }
 0x88f   : > { %4461 = vmatpush3.bf16.xpose.msra.mxu1 %v2713_v31  ;;  %4462 = vmatprep.mubr.msk.bf16.mxu1 %vm5348_vm0, %v5347_v38 }
 0x890   : > { %4466 = vmatprep.subr.bf16.mxu1 %v5347_v38 }
 0x896   : > { %4463 = vmatmul.mubr.msk.bf16.vlgmr.msra.gmra.mrb[44].mxu1 %vm2346_vm1, %v5798_v44 }
 0x897   : > { %4468 = vmatprep.mubr.msk.bf16.mxu1 %vm5348_vm0, %v5347_v38 }
 0x961   : > { %v5839_v12 = vpop.f32.mrb[40].mxu1 }
 0x962   : > { %v4458_v33 = vpop.f32.mrb[41].mxu1 }
 0x963   : > { %v5841_v37 = vpop.f32.mrb[42].mxu1 }
 0x964   : > { %v2702_v40 = vpack.c.bf16 %v5841_v37, %v5839_v12  ;;  %v4459_v41 = vpop.f32.mrb[43].mxu1  ;;  %v5014_v12 = vld [vmem:[#allocation11 + $0x1b4] ss:$12 sps:$4 sm:$0xff]  }
 0x965   : > { %v5016_v37 = vld [vmem:[#allocation11 + $0x1c8] ss:$12 sps:$4 sm:$0xff]  }
 0x969   : > { %v2749_v42 = vpop.f32.mrb[44].mxu1 }
 0x96a   : > { %v2750_v43 = vadd.f32 %v2749_v42, %v5752_v36  ;;  %v4464_v32 = vpop.f32.mrb[45].mxu1  ;;  %v2999_v36 = vsel %vm2394_vm2, %v2993_v58, -inf }
 0x96b   : > { %v2752_v45 = vpop.f32.mrb[46].mxu1 }
 0x96c   : > { %v2753_v44 = vadd.f32 %v2752_v45, %v5754_v39  ;;  %v4465_v30 = vpop.f32.mrb[47].mxu1  ;;  %v2756_v48 = vsel %vm2394_vm2, %v2750_v43, -inf }
 0x96d   : > { %2757 = vmax.xlane.f32.xlu1 %v2756_v48 }
 0x96e   : > { %v2759_v49 = vsel %vm2394_vm2, %v2753_v44, -inf }
 0x96f   : > { %2760 = vmax.xlane.f32.xlu0 %v2759_v49 }
 0x971   : > { %2997 = vmax.xlane.f32.xlu1 %v2996_v50 }
 0x973   : > { %2876 = vmax.xlane.f32.xlu0 %v2875_v53 }
 0x977   : > { %2879 = vmax.xlane.f32.xlu0 %v2878_v59 }
 0x97b   : > { %3000 = vmax.xlane.f32.xlu0 %v2999_v36 }
 0x9fa   : > { %v2758_v62 = vpop.xlane.xlu1 %2757 }
 0x9fb   : > { %v2762_v60 = vsub.f32 %v2750_v43, %v2758_v62  ;;  %v4940_v62 = vld [vmem:[#allocation11] ss:$12 sps:$4 sm:$0xff]  }
 0x9fc   : > { %v2761_v56 = vpop.xlane.xlu0 %2760 }
 0x9fd   : > { %v2764_v63 = vmul.f32 1.442695, %v2762_v60  ;;  %v2763_v0 = vsub.f32 %v2753_v44, %v2761_v56  ;;  %v4942_v60 = vld [vmem:[#allocation11 + $0x4] ss:$12 sps:$4 sm:$0xff]   ;;  %v4945_v56 = vld [vmem:[#allocation11 + $0x1c] ss:$12 sps:$4 sm:$0xff]  }
 0x9fe   : > { %v2998_v47 = vpop.xlane.xlu1 %2997  ;;  %3586 = vmatprep.subr.bf16.mxu0 %v4942_v60 }
 0x9ff   : > { %5060 = vpow2.f32 %v2764_v63  ;;  %v2766_v1 = vmul.f32 1.442695, %v2763_v0  ;;  %v3002_v4 = vsub.f32 %v2990_v46, %v2998_v47  ;;  %3587 = vmatpush1.bf16.msra.mxu0 %v4940_v62  ;;  %v4943_v63 = vld [vmem:[#allocation11 + $0x18] ss:$12 sps:$4 sm:$0xff]   ;;  %v4948_v0 = vld [vmem:[#allocation11 + $0x34] ss:$12 sps:$4 sm:$0xff]  }
 0xa00   : > { %v2877_v2 = vpop.xlane.xlu0 %2876  ;;  %3588 = vmatprep.subr.bf16.mxu0 %v4945_v56  ;;  %v4968_v47 = vld [vmem:[#allocation11 + $0x8] ss:$12 sps:$4 sm:$0xff]  }
 0xa01   : > { %5062 = vpow2.f32 %v2766_v1  ;;  %v2881_v3 = vsub.f32 %v2869_v11, %v2877_v2  ;;  %v3004_v7 = vmul.f32 1.442695, %v3002_v4  ;;  %v4967_v1 = vld [vmem:[#allocation11 + $0xc8] ss:$12 sps:$4 sm:$0xff]   ;;  %v4946_v2 = vld [vmem:[#allocation11 + $0x30] ss:$12 sps:$4 sm:$0xff]  }
 0xa02   : > { %v4951_v4 = vld [vmem:[#allocation11 + $0x4c] ss:$12 sps:$4 sm:$0xff]  }
 0xa03   : > { %v2883_v5 = vmul.f32 1.442695, %v2881_v3  ;;  %3589 = vmatpush1.bf16.msra.mxu0 %v4943_v63  ;;  %v4972_v3 = vld [vmem:[#allocation11 + $0xe0] ss:$12 sps:$4 sm:$0xff]  }
 0xa04   : > { %v2880_v39 = vpop.xlane.xlu0 %2879  ;;  %3590 = vmatprep.subr.bf16.mxu0 %v4948_v0 }
 0xa05   : > { %5064 = vpow2.f32 %v2883_v5  ;;  %v2882_v61 = vsub.f32 %v2872_v51, %v2880_v39  ;;  %v4973_v5 = vld [vmem:[#allocation11 + $0x20] ss:$12 sps:$4 sm:$0xff]   ;;  %v4977_v39 = vld [vmem:[#allocation11 + $0xf8] ss:$12 sps:$4 sm:$0xff]  }
 0xa07   : > { %v2885_v8 = vmul.f32 1.442695, %v2882_v61  ;;  %3591 = vmatpush1.bf16.msra.mxu0 %v4946_v2  ;;  %v4949_v61 = vld [vmem:[#allocation11 + $0x48] ss:$12 sps:$4 sm:$0xff]  }
 0xa08   : > { %v3001_v54 = vpop.xlane.xlu0 %3000  ;;  %3592 = vmatprep.subr.bf16.mxu0 %v4951_v4 }
 0xa09   : > { %v5061_v10 = vpop.eup %5060  ;;  %5066 = vpow2.f32 %v2885_v8  ;;  %v3003_v14 = vsub.f32 %v2993_v58, %v3001_v54  ;;  %v4978_v8 = vld [vmem:[#allocation11 + $0x38] ss:$12 sps:$4 sm:$0xff]   ;;  %v4982_v54 = vld [vmem:[#allocation11 + $0x110] ss:$12 sps:$4 sm:$0xff]  }
 0xa0a   : > { %v2768_v15 = vsel %vm2394_vm2, %v5061_v10, 0.0  ;;  %5068 = vpow2.f32 %v3004_v7  ;;  %v4954_v7 = vld [vmem:[#allocation11 + $0x64] ss:$12 sps:$4 sm:$0xff]  }
 0xa0b   : > { %v5063_v16 = vpop.eup %5062  ;;  %v3006_v17 = vmul.f32 1.442695, %v3003_v14  ;;  %2769 = vadd.xlane.f32.xlu1 %v2768_v15  ;;  %3593 = vmatpush1.bf16.msra.mxu0 %v4949_v61  ;;  %v4957_v14 = vld [vmem:[#allocation11 + $0x7c] ss:$12 sps:$4 sm:$0xff]  }
 0xa0c   : > { %v2771_v18 = vsel %vm2394_vm2, %v5063_v16, 0.0  ;;  %3594 = vmatprep.subr.bf16.mxu0 %v4954_v7  ;;  %v4983_v15 = vld [vmem:[#allocation11 + $0x50] ss:$12 sps:$4 sm:$0xff]  }
 0xa0d   : > { %2772 = vadd.xlane.f32.xlu0 %v2771_v18  ;;  %5070 = vpow2.f32 %v3006_v17  ;;  %v4955_v17 = vld [vmem:[#allocation11 + $0x78] ss:$12 sps:$4 sm:$0xff]   ;;  %v4960_v18 = vld [vmem:[#allocation11 + $0x94] ss:$12 sps:$4 sm:$0xff]   ;;  %v5010_v7 = vld [vmem:[#allocation11 + $0x19c] ss:$12 sps:$4 sm:$0xff]  }
 0xa0f   : > { %v5065_v19 = vpop.eup %5064 }
 0xa10   : > { %v2887_v20 = vsel %vm2394_vm2, %v5065_v19, 0.0 }
 0xa11   : > { %2888 = vadd.xlane.f32.xlu1 %v2887_v20  ;;  %v4992_v20 = vld [vmem:[#allocation11 + $0x140] ss:$12 sps:$4 sm:$0xff]  }
 0xa13   : > { %v5067_v21 = vpop.eup %5066 }
 0xa14   : > { %v2890_v22 = vsel %vm2394_vm2, %v5067_v21, 0.0  ;;  %v5069_v23 = vpop.eup %5068 }
 0xa15   : > { %2891 = vadd.xlane.f32.xlu0 %v2890_v22  ;;  %v3008_v24 = vsel %vm2394_vm2, %v5069_v23, 0.0  ;;  %v4963_v22 = vld [vmem:[#allocation11 + $0xac] ss:$12 sps:$4 sm:$0xff]  }
 0xa17   : > { %v5071_v25 = vpop.eup %5070 }
 0xa18   : > { %v3011_v26 = vsel %vm2394_vm2, %v5071_v25, 0.0 }
 0xa19   : > { %3009 = vadd.xlane.f32.xlu0 %v3008_v24  ;;  %v4997_v24 = vld [vmem:[#allocation11 + $0x158] ss:$12 sps:$4 sm:$0xff]  }
 0xa1d   : > { %3012 = vadd.xlane.f32.xlu0 %v3011_v26  ;;  %v4966_v26 = vld [vmem:[#allocation11 + $0xc4] ss:$12 sps:$4 sm:$0xff]  }
 0xa22   : > { %2780 = vrot.lane.b32.xlu1 %v5748_v35, %s5350_s8 }
 0xa33   : > { %3020 = vrot.lane.b32.xlu0 %v5744_v27, %s5350_s8 }
 0xa98   : > { %v2770_v28 = vpop.xlane.xlu1 %2769 }
 0xa99   : > { %5072 = vrcp.f32 %v2770_v28  ;;  %v4998_v28 = vld [vmem:[#allocation11 + $0x98] ss:$12 sps:$4 sm:$0xff]  }
 0xa9a   : > { %v2773_v29 = vpop.xlane.xlu0 %2772 }
 0xa9b   : > { %5074 = vrcp.f32 %v2773_v29  ;;  %v4964_v29 = vld [vmem:[#allocation11 + $0xc0] ss:$12 sps:$4 sm:$0xff]  }
 0xa9e   : > { %v2889_v31 = vpop.xlane.xlu1 %2888 }
 0xa9f   : > { %5076 = vrcp.f32 %v2889_v31  ;;  %v4971_v31 = vld [vmem:[#allocation11 + $0xdc] ss:$12 sps:$4 sm:$0xff]  }
 0xaa2   : > { %v2781_v33 = vpop.permute.xlu1 %2780  ;;  %v2892_v41 = vpop.xlane.xlu0 %2891 }
 0xaa3   : > { %v5073_v42 = vpop.eup %5072  ;;  %5078 = vrcp.f32 %v2892_v41  ;;  %4467 = vmatpush3.bf16.msra.mxu1 %v2781_v33  ;;  %v4969_v33 = vld [vmem:[#allocation11 + $0xd8] ss:$12 sps:$4 sm:$0xff]   ;;  %v4976_v41 = vld [vmem:[#allocation11 + $0xf4] ss:$12 sps:$4 sm:$0xff]  }
 0xaa4   : > { %4478 = vmatprep.subr.bf16.mxu1 %v5347_v38  ;;  %v2776_v32 = vmul.f32 %v5073_v42, %v5061_v10  ;;  %v4952_v10 = vld [vmem:[#allocation11 + $0x60] ss:$12 sps:$4 sm:$0xff]   ;;  %v4974_v42 = vld [vmem:[#allocation11 + $0xf0] ss:$12 sps:$4 sm:$0xff]  }
 0xaa5   : > { %v5075_v43 = vpop.eup %5074  ;;  %3595 = vmatpush1.bf16.msra.mxu0 %v4952_v10  ;;  %v5011_v10 = vld [vmem:[#allocation11 + $0x1a0] ss:$12 sps:$4 sm:$0xff]  }
 0xaa6   : > { %v2777_v45 = vmul.f32 %v5075_v43, %v5063_v16  ;;  %v3010_v35 = vpop.xlane.xlu0 %3009  ;;  %v4987_v16 = vld [vmem:[#allocation11 + $0x128] ss:$12 sps:$4 sm:$0xff]   ;;  %3596 = vmatprep.subr.bf16.mxu0 %v4957_v14  ;;  %v4981_v43 = vld [vmem:[#allocation11 + $0x10c] ss:$12 sps:$4 sm:$0xff]   ;;  %v5022_v14 = vld [vmem:[#allocation11 + $0x1e4] ss:$12 sps:$4 sm:$0xff]  }
 0xaa7   : > { %5080 = vrcp.f32 %v3010_v35  ;;  %v4984_v35 = vld [vmem:[#allocation11 + $0x120] ss:$12 sps:$4 sm:$0xff]  }
 0xaa8   : > { %v2778_v46 = vpack.c.bf16 %v2777_v45, %v2776_v32  ;;  %v4979_v32 = vld [vmem:[#allocation11 + $0x108] ss:$12 sps:$4 sm:$0xff]   ;;  %v4986_v45 = vld [vmem:[#allocation11 + $0x124] ss:$12 sps:$4 sm:$0xff]  }
 0xaa9   : > { %v5077_v30 = vpop.eup %5076  ;;  %3597 = vmatpush1.bf16.msra.mxu0 %v4955_v17  ;;  %v5024_v17 = vld [vmem:[#allocation11 + $0x1f8] ss:$12 sps:$4 sm:$0xff]  }
 0xaaa   : > { %4469 = vmatmul.mubr.msk.bf16.vlgmr.msra.gmra.mrb[48].mxu1 %vm2394_vm2, %v2778_v46  ;;  %v3013_v44 = vpop.xlane.xlu0 %3012  ;;  %v2895_v11 = vmul.f32 %v5077_v30, %v5065_v19  ;;  %v4988_v19 = vld [vmem:[#allocation11 + $0x68] ss:$12 sps:$4 sm:$0xff]   ;;  %3598 = vmatprep.subr.bf16.mxu0 %v4960_v18  ;;  %v5027_v18 = vld [vmem:[#allocation11 + $0x200] ss:$12 sps:$4 sm:$0xff]  }
 0xaab   : > { %4479 = vmatpush3.bf16.msra.mxu1 %v5744_v27  ;;  %5082 = vrcp.f32 %v3013_v44  ;;  %4480 = vmatprep.mubr.msk.bf16.mxu1 %vm5348_vm0, %v5347_v38  ;;  %v4991_v46 = vld [vmem:[#allocation11 + $0x13c] ss:$12 sps:$4 sm:$0xff]   ;;  %v4989_v44 = vld [vmem:[#allocation11 + $0x138] ss:$12 sps:$4 sm:$0xff]   ;;  %v4996_v30 = vld [vmem:[#allocation11 + $0x154] ss:$12 sps:$4 sm:$0xff]  }
 0xaac   : > { %4490 = vmatprep.subr.bf16.mxu1 %v5347_v38 }
 0xaad   : > { %v5079_v48 = vpop.eup %5078 }
 0xaae   : > { %v2896_v49 = vmul.f32 %v5079_v48, %v5067_v21  ;;  %v3021_v51 = vpop.permute.xlu0 %3020  ;;  %v4958_v21 = vld [vmem:[#allocation11 + $0x90] ss:$12 sps:$4 sm:$0xff]  }
 0xaaf   : > { %3599 = vmatpush1.bf16.msra.mxu0 %v4958_v21  ;;  %v4994_v48 = vld [vmem:[#allocation11 + $0x150] ss:$12 sps:$4 sm:$0xff]   ;;  %v5031_v21 = vld [vmem:[#allocation11 + $0x218] ss:$12 sps:$4 sm:$0xff]  }
 0xab0   : > { %v2897_v50 = vpack.c.bf16 %v2896_v49, %v2895_v11  ;;  %3600 = vmatprep.subr.bf16.mxu0 %v4963_v22  ;;  %v4999_v11 = vld [vmem:[#allocation11 + $0x168] ss:$12 sps:$4 sm:$0xff]   ;;  %v5001_v49 = vld [vmem:[#allocation11 + $0x16c] ss:$12 sps:$4 sm:$0xff]  }
 0xab1   : > { %v5081_v53 = vpop.eup %5080  ;;  %v5034_v22 = vld [vmem:[#allocation11 + $0x22c] ss:$12 sps:$4 sm:$0xff]  }
 0xab2   : > { %4481 = vmatmul.mubr.msk.bf16.vlgmr.msra.gmra.mrb[52].mxu1 %vm2394_vm2, %v2897_v50  ;;  %v3016_v27 = vmul.f32 %v5081_v53, %v5069_v23  ;;  %v4993_v23 = vld [vmem:[#allocation11 + $0x80] ss:$12 sps:$4 sm:$0xff]   ;;  %v5002_v50 = vld [vmem:[#allocation11 + $0x170] ss:$12 sps:$4 sm:$0xff]  }
 0xab3   : > { %4491 = vmatpush3.bf16.msra.mxu1 %v3021_v51  ;;  %4492 = vmatprep.mubr.msk.bf16.mxu1 %vm5348_vm0, %v5347_v38  ;;  %v5003_v51 = vld [vmem:[#allocation11 + $0xb0] ss:$12 sps:$4 sm:$0xff]  }
 0xab4   : > { %4333 = vmatprep.subr.bf16.mxu1 %v4967_v1  ;;  %v5006_v53 = vld [vmem:[#allocation11 + $0x184] ss:$12 sps:$4 sm:$0xff]  }
 0xab5   : > { %v5083_v58 = vpop.eup %5082 }
 0xab6   : > { %v3017_v59 = vmul.f32 %v5083_v58, %v5071_v25  ;;  %v4961_v25 = vld [vmem:[#allocation11 + $0xa8] ss:$12 sps:$4 sm:$0xff]  }
 0xab7   : > { %3601 = vmatpush1.bf16.msra.mxu0 %v4961_v25 }
 0xab8   : > { %v3018_v36 = vpack.c.bf16 %v3017_v59, %v3016_v27  ;;  %3602 = vmatprep.subr.bf16.mxu0 %v4966_v26 }
 0xaba   : > { %4493 = vmatmul.mubr.msk.bf16.vlgmr.msra.gmra.mrb[56].mxu1 %vm2394_vm2, %v3018_v36 }
 0xabb   : > { %4334 = vmatpush3.bf16.msra.mxu1 %v4968_v47  ;;  %3603 = vmatpush1.bf16.msra.mxu0 %v4964_v29 }
 0xabc   : > { %4335 = vmatprep.subr.bf16.mxu1 %v4972_v3  ;;  %3604 = vmatprep.subr.bf16.mxu0 %v4971_v31 }
 0xabf   : > { %4336 = vmatpush3.bf16.msra.mxu1 %v4973_v5  ;;  %3605 = vmatpush1.bf16.msra.mxu0 %v4969_v33 }
 0xac0   : > { %4337 = vmatprep.subr.bf16.mxu1 %v4977_v39  ;;  %3606 = vmatprep.subr.bf16.mxu0 %v4976_v41 }
 0xac3   : > { %4338 = vmatpush3.bf16.msra.mxu1 %v4978_v8  ;;  %3607 = vmatpush1.bf16.msra.mxu0 %v4974_v42 }
 0xac4   : > { %4339 = vmatprep.subr.bf16.mxu1 %v4982_v54  ;;  %3608 = vmatprep.subr.bf16.mxu0 %v4981_v43  ;;  %v5008_v54 = vld [vmem:[#allocation11 + $0x198] ss:$12 sps:$4 sm:$0xff]   ;;  %v3187_v43 = vlaneseq }
 0xac7   : > { %4340 = vmatpush3.bf16.msra.mxu1 %v4983_v15  ;;  %3609 = vmatpush1.bf16.msra.mxu0 %v4979_v32  ;;  %v5023_v15 = vld [vmem:[#allocation11 + $0x1e8] ss:$12 sps:$4 sm:$0xff]  }
 0xac8   : > { %4341 = vmatprep.subr.bf16.mxu1 %v4987_v16  ;;  %3610 = vmatprep.subr.bf16.mxu0 %v4986_v45  ;;  %v5026_v16 = vld [vmem:[#allocation11 + $0x1fc] ss:$12 sps:$4 sm:$0xff]   ;;  %v3185_v45 = vld [vmem:[%s5975_s6] sm:$0x7] }
 0xacb   : > { %4342 = vmatpush3.bf16.msra.mxu1 %v4988_v19  ;;  %3611 = vmatpush1.bf16.msra.mxu0 %v4984_v35  ;;  %v5030_v19 = vld [vmem:[#allocation11 + $0x214] ss:$12 sps:$4 sm:$0xff]  }
 0xacc   : > { %4343 = vmatprep.subr.bf16.mxu1 %v4992_v20  ;;  %3612 = vmatprep.subr.bf16.mxu0 %v4991_v46  ;;  %v5028_v20 = vld [vmem:[#allocation11 + $0x210] ss:$12 sps:$4 sm:$0xff]  }
 0xacf   : > { %4344 = vmatpush3.bf16.msra.mxu1 %v4993_v23  ;;  %3613 = vmatpush1.bf16.msra.mxu0 %v4989_v44  ;;  %v5032_v23 = vld [vmem:[#allocation11 + $0x228] ss:$12 sps:$4 sm:$0xff]  }
 0xad0   : > { %4345 = vmatprep.subr.bf16.mxu1 %v4997_v24  ;;  %3614 = vmatprep.subr.bf16.mxu0 %v4996_v30  ;;  %v5035_v24 = vld [vmem:[#allocation11 + $0x230] ss:$12 sps:$4 sm:$0xff]  }
 0xad3   : > { %4346 = vmatpush3.bf16.msra.mxu1 %v4998_v28  ;;  %3615 = vmatpush1.bf16.msra.mxu0 %v4994_v48 }
 0xad4   : > { %3616 = vmatprep.subr.bf16.mxu0 %v5001_v49  ;;  %4347 = vmatprep.subr.bf16.mxu1 %v5002_v50 }
 0xad7   : > { %3617 = vmatpush1.bf16.msra.mxu0 %v4999_v11  ;;  %4348 = vmatpush3.bf16.msra.mxu1 %v5003_v51 }
 0xad8   : > { %4496 = vmatprep.subr.bf16.mxu1 %v5347_v38  ;;  %3629 = vmatprep.subr.bf16.mxu0 %v5006_v53 }
 0xb7d   : > { %v2820_v58 = vpop.f32.mrb[48].mxu1 }
 0xb7e   : > { %v4470_v27 = vpop.f32.mrb[49].mxu1 }
 0xb7f   : > { %v2823_v59 = vpop.f32.mrb[50].mxu1 }
 0xb80   : > { %v2827_v36 = vpack.c.bf16 %v2823_v59, %v2820_v58  ;;  %v4471_v62 = vpop.f32.mrb[51].mxu1 }
 0xb82   : > { %3072 = vrot.lane.b32.xlu1 %v2827_v36, %s5350_s8 }
 0xb85   : > { %v5882_v60 = vpop.f32.mrb[52].mxu1 }
 0xb86   : > { %3069 = vrot.lane.b32.xlu1 %v2587_v57, %s5350_s8  ;;  %v4482_v56 = vpop.f32.mrb[53].mxu1  ;;  %v5007_v57 = vld [vmem:[#allocation11 + $0x188] ss:$12 sps:$4 sm:$0xff]  }
 0xb87   : > { %v5888_v63 = vpop.f32.mrb[54].mxu1 }
 0xb88   : > { %v2942_v0 = vpack.c.bf16 %v5888_v63, %v5882_v60  ;;  %v4483_v1 = vpop.f32.mrb[55].mxu1 }
 0xb8d   : > { %v3060_v47 = vpop.f32.mrb[56].mxu1 }
 0xb8e   : > { %v4494_v2 = vpop.f32.mrb[57].mxu1 }
 0xb8f   : > { %v3063_v3 = vpop.f32.mrb[58].mxu1 }
 0xb90   : > { %v3067_v4 = vpack.c.bf16 %v3063_v3, %v3060_v47  ;;  %v4495_v5 = vpop.f32.mrb[59].mxu1 }
 0xb92   : > { %3075 = vrot.lane.b32.xlu1 %v3067_v4, %s5350_s8 }
 0xbf4   : > { %v3073_v39 = vpop.permute.xlu1 %3072 }
 0xbf5   : > { %v3083_v52 = vsel %vm2346_vm1, %v2702_v40, %v3073_v39  ;;  %v5019_v40 = vld [vmem:[#allocation11 + $0x1d0] ss:$12 sps:$4 sm:$0xff]  }
 0xbf6   : > { %3618 = vmatprep.mubr.bf16.mxu0 %v3083_v52  ;;  %3704 = vmatprep.mubr.bf16.mxu1 %v3083_v52 }
 0xbf8   : > { %v3070_v61 = vpop.permute.xlu1 %3069 }
 0xbf9   : > { %v3079_v8 = vsel %vm2346_vm1, %v2462_v13, %v3070_v61  ;;  %v5018_v13 = vld [vmem:[#allocation11 + $0x1cc] ss:$12 sps:$4 sm:$0xff]  }
 0xbfa   : > { %3619 = vmatmul.mubr.bf16.vlgmr.msra.gmra.mrb[24].mxu0 %v3079_v8  ;;  %3705 = vmatmul.mubr.bf16.vlgmr.msra.gmra.mrb[60].mxu1 %v3079_v8 }
 0xbfb   : > { %3630 = vmatpush1.bf16.msra.mxu0 %v5004_v55  ;;  %4497 = vmatpush3.bf16.msra.mxu1 %v5007_v57 }
 0xbfc   : > { %3631 = vmatprep.subr.bf16.mxu0 %v5010_v7  ;;  %4498 = vmatprep.subr.bf16.mxu1 %v5347_v38 }
 0xbfd   : > { %3661 = vmatprep.mubr.bf16.mxu0 %v5349_v6  ;;  %4512 = vmatprep.mubr.msk.bf16.mxu1 %vm5348_vm0, %v5347_v38  ;;  %v5020_v6 = vld [vmem:[#allocation11 + $0x1e0] ss:$12 sps:$4 sm:$0xff]  }
 0xbff   : > { %3632 = vmatpush1.bf16.msra.mxu0 %v5008_v54  ;;  %4499 = vmatpush3.bf16.msra.mxu1 %v5011_v10 }
 0xc00   : > { %3633 = vmatprep.subr.bf16.mxu0 %v5014_v12  ;;  %4500 = vmatprep.subr.bf16.mxu1 %v5347_v38 }
 0xc03   : > { %3634 = vmatpush1.bf16.msra.mxu0 %v5012_v9  ;;  %4501 = vmatpush3.bf16.msra.mxu1 %v5015_v34 }
 0xc04   : > { %3635 = vmatprep.subr.bf16.mxu0 %v5018_v13  ;;  %4502 = vmatprep.subr.bf16.mxu1 %v5347_v38  ;;  %v3076_v25 = vpop.permute.xlu1 %3075 }
 0xc05   : > { %v3087_v26 = vsel %vm2346_vm1, %v2942_v0, %v3076_v25 }
 0xc07   : > { %3636 = vmatpush1.bf16.msra.mxu0 %v5016_v37  ;;  %4503 = vmatpush3.bf16.msra.mxu1 %v5019_v40 }
 0xc08   : > { %3637 = vmatprep.subr.bf16.mxu0 %v5022_v14  ;;  %4504 = vmatprep.subr.bf16.mxu1 %v5347_v38 }
 0xc0b   : > { %3638 = vmatpush1.bf16.msra.mxu0 %v5020_v6  ;;  %4505 = vmatpush3.bf16.msra.mxu1 %v5023_v15 }
 0xc0c   : > { %3639 = vmatprep.subr.bf16.mxu0 %v5026_v16  ;;  %4506 = vmatprep.subr.bf16.mxu1 %v5347_v38 }
 0xc0f   : > { %3640 = vmatpush1.bf16.msra.mxu0 %v5024_v17  ;;  %4507 = vmatpush3.bf16.msra.mxu1 %v5027_v18 }
 0xc10   : > { %3641 = vmatprep.subr.bf16.mxu0 %v5030_v19  ;;  %4508 = vmatprep.subr.bf16.mxu1 %v5347_v38 }
 0xc13   : > { %3642 = vmatpush1.bf16.msra.mxu0 %v5028_v20  ;;  %4509 = vmatpush3.bf16.msra.mxu1 %v5031_v21 }
 0xc14   : > { %3643 = vmatprep.subr.bf16.mxu0 %v5034_v22  ;;  %4510 = vmatprep.subr.bf16.mxu1 %v5347_v38  ;;  %v3188_v38 = vshrl.u32 %v3187_v43, 7 }
 0xc16   : > { %v3197_v32 = vsub.s32 2, %v3188_v38  ;;  %v3189_v35 = vsub.s32 0, %v3188_v38  ;;  %v3193_v46 = vsub.s32 1, %v3188_v38 }
 0xc17   : > { %3644 = vmatpush1.bf16.msra.mxu0 %v5032_v23  ;;  %4511 = vmatpush3.bf16.msra.mxu1 %v5035_v24 }
 0xc18   : > { %v3198_v44 = vrot.slane %v3185_v45, %v3197_v32  ;;  %v3190_v30 = vrot.slane %v3185_v45, %v3189_v35  ;;  %v3194_v48 = vrot.slane %v3185_v45, %v3193_v46 }
 0xc1a   : > { %3662 = vmatmul.mubr.bf16.vlgmr.msra.gmra.mrb[24].mxu0 %v3087_v26  ;;  %4513 = vmatmul.mubr.bf16.vlgmr.msra.gmra.mrb[64].mxu1 %v3087_v26 }
 0xccd   : > { %v4349_v28 = vpop.f32.mrb[60].mxu1 }
 0xcce   : > { %v4350_v29 = vpop.f32.mrb[61].mxu1 }
 0xccf   : > { %v4351_v31 = vadd.f32 %v4350_v29, %v4349_v28  ;;  %v4352_v33 = vpop.f32.mrb[62].mxu1 }
 0xcd0   : > { %v4353_v41 = vpop.f32.mrb[63].mxu1 }
 0xcd1   : > { %v4354_v42 = vadd.f32 %v4353_v41, %v4352_v33  ;;  %v3707_v11 = vadd.f32 %v4351_v31, %v3198_v44 }
 0xcd3   : > { %v3710_v59 = vadd.f32 %v4354_v42, %v3198_v44 }
 0xced   : > { %v3663_v49 = vpop.f32.mrb[24].mxu0  ;;  %v3747_v50 = vpop.f32.mrb[64].mxu1 }
 0xcee   : > { %v4516_v51 = vadd.f32 %v3663_v49, %v3190_v30  ;;  %v3748_v53 = vadd.f32 %v3747_v50, %v3707_v11  ;;  %v3665_v58 = vpop.f32.mrb[25].mxu0  ;;  %v4514_v27 = vpop.f32.mrb[65].mxu1 }
 0xcef   : > { %v4517_v36 = vadd.f32 %v3665_v58, %v3194_v48  ;;  %v3667_v62 = vpop.f32.mrb[26].mxu0  ;;  %v3750_v60 = vpop.f32.mrb[66].mxu1 }
 0xcf0   : > { %3754 = vst [vmem:[%s369_s29] sm:$0xff] %v4516_v51  ;;  %3756 = vst [vmem:[%s369_s29 + $0x10] sm:$0xff] %v3748_v53  ;;  %v4518_v56 = vadd.f32 %v3667_v62, %v3190_v30  ;;  %v3751_v63 = vadd.f32 %v3750_v60, %v3710_v59  ;;  %v3669_v0 = vpop.f32.mrb[27].mxu0  ;;  %v4515_v1 = vpop.f32.mrb[67].mxu1 }
 0xcf1   : > { %3755 = vst [vmem:[%s369_s29 + $0x8] sm:$0xff] %v4517_v36  ;;  %v4519_v47 = vadd.f32 %v3669_v0, %v3194_v48 }
 0xcf2   : > { %3757 = vst [vmem:[%s369_s29 + $0x18] sm:$0xff] %v4518_v56  ;;  %3759 = vst [vmem:[%s369_s29 + $0x28] sm:$0xff] %v3751_v63 }
 0xcf3   : > { %3758 = vst [vmem:[%s369_s29 + $0x20] sm:$0xff] %v4519_v47 }
 0xcf4   : > { %5270 = shalt.err (!%p5267_p8)
}
 0xcf5   : > { %s5271_s8 = scalar_lea.hbm %s5925_s1, 768  ;;  %s5275_s13 = scalar_lea.hbm %s5976_s7, 1536 }
 0xcf6   : > { %p5272_p6 = scmp.ne.s32.totalorder %s5925_s1, %s5271_s8  ;;  %p5276_p3 = scmp.lt.u32.totalorder %s5925_s1, %s5976_s7 }
 0xcf7   : > { %p5277_p0 = scmp.lt.u32.totalorder %s5275_s13, %s5271_s8  ;;  %p5279_p2 = scmp.lt.u32.totalorder %s5271_s8, %s5925_s1 }
 0xcf8   : > { %p5273_p9 = pnand %p5272_p6, %p6001_p7 }
 0xcf9   : > { %p5278_p5 = por %p5277_p0, %p5276_p3 }
 0xcfa   : > { %p5274_p4 = pneg %p5273_p9 }
 0xcfb   : > { %p5280_p10 = por %p5279_p2, %p5278_p5 }
 0xcfd   : > { %p5281_p1 = pnand %p5280_p10, %p5274_p4 }
 0xcff   : > { %5284 = shalt.err (!%p5281_p1)
}
 0xd00   : > { %s5352_s30 = smov 384   ;;  %s5353_s9 = smov 24  }
 0xd01   : > { %4563 = dma.vmem_to_hbm [thread:$0]  (%p6001_p7), %s5920_s28, 768, %s5925_s1, %s3761_s22, %s5352_s30, %s5352_s30, %s5353_s9  }
 0xd02 PF: > { %s3789_s23 = sand.u32 1, %s5323_s24   ;;  %p6002_p11 = scmp.ne.s32.totalorder %s5990_s17, 0 }
 0xd03   : > { %p6003_p12 = scmp.ge.s32.totalorder %s5335_s27, 2  ;;  %s3790_s11 = scalar_lea.sflag [#allocation4], %s3789_s23 }
 0xd05   : > { %p4586_p13 = pnand %p6003_p12, %p6002_p11 }
 0xd07   : > { %5318 = dma.done.wait (!%p4586_p13), %s3790_s11, 768  }
 0xd08   : > { %5320 = vsyncadd (!%p4586_p13), %s3790_s11, 4294966528  ;;  %p23_p8 = scmp.ge.s32.totalorder %s5560_s19, 4   ;;  %s6004_s24 = smov %s5327_s25 }
 0xd09   : > { %s6005_s25 = smov %s5331_s26  ;;  %s6006_s26 = smov %s5572_s12 }
 0xd0a   : > { %s6007_s27 = smov %s5560_s19  ;;  %25 = sbr.rel (!%p23_p8) target bundleno = 10 (0xa), region = 113 }
 0xd11   :  { %3795 = vsyncpa [#allocation3], 1 }
 0xd12   :  { %3797 = vsyncpa [#allocation3 + $0x1], 1 }
 0xd13   :  { %3798 = vsyncpa [#allocation6], 1 }
 0xd14   :  { %3799 = vsyncpa [#allocation9], 1 }
 0xd15   :  { %3800 = vsyncpa [#allocation12], 1 }
 0xd16   :  { %3801 = vsyncpa [#allocation4], 1 }
 0xd17   :  { %3803 = vsyncpa [#allocation4 + $0x1], 1 }

</bundles_post_ra>
